<compile_context>
chip_gen: v5e
topology: v5e:2x2
jax: 0.10.0
libtpu: 0.0.40
codegen_flags: <defaults>
</compile_context>

<pallas_src>
import jax
import jax.numpy as jnp
from jax.experimental import pallas as pl
from jax.experimental.pallas import tpu as pltpu

M, K, N = 32, 64, 10          # batch, in_features, out_features (torch Linear(64, 10))
KB = 72                       # packed param rows: 64 (W^T) + 1 (bias) + 7 pad -> multiple of 8


def net_kernel(x_ref, y_ref, wb_ref, o_ref):
    # elementwise hot path: sin(x) + cos(y)                    (VPU / EUP)
    h = jnp.sin(x_ref[...]) + jnp.cos(y_ref[...])              # (M, K) f32

    # static, sublane-aligned views into the packed param block (zero cost)
    w = wb_ref[:K, :]                                           # (K, N)  rows 0..63
    b = wb_ref[K:K + 1, :]                                      # (1, N)  row 64

    # linear layer on the MXU, f32 operands kept at full precision, f32 acc
    acc = jnp.dot(h, w,
                  preferred_element_type=jnp.float32,
                  precision=jax.lax.Precision.HIGHEST)          # (M, N)

    # bias add + direct (32, 10) store (masked vst — negligible at this size)
    o_ref[...] = acc + b


def prepare_params(weight, bias):
    """One-time parameter packing (outside the per-call hot path).

    weight: (N, K) torch layout, bias: (N,)
      -> single (KB, N) f32 array: rows 0..K-1 = weight.T, row K = bias,
         remaining rows zero (sublane padding to a multiple of 8).
    """
    wb = jnp.zeros((KB, N), jnp.float32)
    wb = wb.at[:K, :].set(weight.T)
    wb = wb.at[K, :].set(bias)
    return wb


_COST = pl.CostEstimate(
    flops=2 * M * K * N,                              # effective matmul work
    transcendentals=2 * M * K,                        # sin + cos
    bytes_accessed=(2 * M * K + (K + 1) * N + M * N) * 4,
)


@jax.jit
def net_forward(x, y, wb_packed):
    """x, y: (M, K) f32.  wb_packed: (KB, N) f32 packed weight+bias."""
    return pl.pallas_call(
        net_kernel,
        out_shape=jax.ShapeDtypeStruct((M, N), jnp.float32),
        in_specs=[
            pl.BlockSpec(memory_space=pltpu.MemorySpace.VMEM),  # x
            pl.BlockSpec(memory_space=pltpu.MemorySpace.VMEM),  # y
            pl.BlockSpec(memory_space=pltpu.MemorySpace.VMEM),  # packed W^T + bias
        ],
        out_specs=pl.BlockSpec(memory_space=pltpu.MemorySpace.VMEM),
        cost_estimate=_COST,
    )(x, y, wb_packed)


if __name__ == "__main__":
    key = jax.random.PRNGKey(0)
    kx, ky, kw, kb = jax.random.split(key, 4)

    # example inputs (same shapes the PyTorch script uses)
    x = jax.random.normal(kx, (M, K), dtype=jnp.float32)
    y = jax.random.normal(ky, (M, K), dtype=jnp.float32)

    # deterministic Linear(64, 10) params, torch layout: weight (N, K), bias (N,)
    bound = 1.0 / jnp.sqrt(K)
    weight = jax.random.uniform(kw, (N, K), jnp.float32, -bound, bound)
    bias = jax.random.uniform(kb, (N,), jnp.float32, -bound, bound)

    # one-time param packing (not in the per-call path)
    wb_packed = prepare_params(weight, bias)
    wb_packed = jax.block_until_ready(wb_packed)

    out = net_forward(x, y, wb_packed)
    out = jax.block_until_ready(out)

    # reference check in plain JAX
    ref = (jnp.sin(x) + jnp.cos(y)) @ weight.T + bias
    assert out.shape == (M, N)
    assert jnp.allclose(out, ref, atol=1e-5, rtol=1e-5)

    print("KERNEL_OK")
</pallas_src>

<mosaic_0001>
module attributes {stable_mosaic.version = 11 : i64} {
  func.func @net_kernel(%arg0: memref<32x64xf32, #tpu.memory_space<vmem>>, %arg1: memref<32x64xf32, #tpu.memory_space<vmem>>, %arg2: memref<72x10xf32, #tpu.memory_space<vmem>>, %arg3: memref<32x10xf32, #tpu.memory_space<vmem>>) attributes {dimension_semantics = [], scalar_prefetch = 0 : i64, scratch_operands = 0 : i64, tpu.core_type = #tpu.core_type<tc>} {
    %c0 = arith.constant 0 : index
    %c0_0 = arith.constant 0 : index
    %0 = vector.load %arg0[%c0, %c0_0] : memref<32x64xf32, #tpu.memory_space<vmem>>, vector<32x64xf32>
    %1 = math.sin %0 : vector<32x64xf32>
    %c0_1 = arith.constant 0 : index
    %c0_2 = arith.constant 0 : index
    %2 = vector.load %arg1[%c0_1, %c0_2] : memref<32x64xf32, #tpu.memory_space<vmem>>, vector<32x64xf32>
    %3 = math.cos %2 : vector<32x64xf32>
    %4 = arith.addf %1, %3 : vector<32x64xf32>
    %c0_3 = arith.constant 0 : index
    %c0_4 = arith.constant 0 : index
    %5 = vector.load %arg2[%c0_3, %c0_4] : memref<72x10xf32, #tpu.memory_space<vmem>>, vector<64x10xf32>
    %c64 = arith.constant 64 : index
    %c0_5 = arith.constant 0 : index
    %6 = vector.load %arg2[%c64, %c0_5] : memref<72x10xf32, #tpu.memory_space<vmem>>, vector<1x10xf32>
    %cst = arith.constant dense<0.000000e+00> : vector<32x10xf32>
    %7 = tpu.matmul %4, %5, %cst {dimension_numbers = #tpu.dot_dimension_numbers<[1], [0], [0], [1], [0, 0, 1, 1], [], []>, precision = #tpu.contract_precision<fp32>} : vector<32x64xf32>, vector<64x10xf32>, vector<32x10xf32> -> vector<32x10xf32>
    %8 = vector.broadcast %6 : vector<1x10xf32> to vector<32x10xf32>
    %9 = arith.addf %7, %8 : vector<32x10xf32>
    %c0_6 = arith.constant 0 : index
    %c0_7 = arith.constant 0 : index
    %10 = vector.load %arg3[%c0_6, %c0_7] : memref<32x10xf32, #tpu.memory_space<vmem>>, vector<32x10xf32>
    tpu.vector_store %arg3[%c0_6, %c0_7], %9 {strides = array<i32>} : memref<32x10xf32, #tpu.memory_space<vmem>>, vector<32x10xf32>,
    return
  }
}

</mosaic_0001>

<bundles_post_ra>
// kernel: net_forward.1
= control target key start
LH: loop header
LB: loop body
LE: loop exit
PB: predicated region body
PF: predicated region fallthrough
CT: control target
= control target key end

     0   :  { %s2878_s2 = inlined_call_operand.vmem [shape: f32[72,10], index: 2, kind: input, shape index: {}]   ;;  %s2879_s0 = inlined_call_operand.vmem [shape: f32[32,64], index: 0, kind: input, shape index: {}]   ;;  %s2880_s1 = inlined_call_operand.vmem [shape: f32[32,64], index: 1, kind: input, shape index: {}]   ;;  %s2881_s3 = inlined_call_operand.vmem [shape: f32[32,10], index: 3, kind: output, shape index: {}]  }
   0x1   :  { %v1269_v0 = vld [vmem:[%s2878_s2 + $0x38] sm:$0xff]  ;;  %v1268_v1 = vld [vmem:[%s2878_s2 + $0x30] sm:$0xff]  ;;  %v1267_v2 = vld [vmem:[%s2878_s2 + $0x28] sm:$0xff] }
   0x2   :  { %v1710_v3 = vand.u32 4294901760, %v1269_v0  ;;  %v1712_v4 = vand.u32 4294901760, %v1268_v1  ;;  %v1714_v5 = vand.u32 4294901760, %v1267_v2  ;;  %v1266_v6 = vld [vmem:[%s2878_s2 + $0x20] sm:$0xff]  ;;  %v1265_v7 = vld [vmem:[%s2878_s2 + $0x18] sm:$0xff]  ;;  %v1264_v8 = vld [vmem:[%s2878_s2 + $0x10] sm:$0xff] }
   0x3   :  { %v1725_v9 = vand.u32 4294901760, %v1266_v6  ;;  %v1727_v10 = vand.u32 4294901760, %v1265_v7  ;;  %v1729_v11 = vand.u32 4294901760, %v1264_v8  ;;  %v1263_v12 = vld [vmem:[%s2878_s2 + $0x8] sm:$0xff]  ;;  %v1780_v29 = vld [vmem:[%s2879_s0 + $0x10] sm:$0xff]  ;;  %v1798_v37 = vld [vmem:[%s2879_s0 + $0x18] sm:$0xff] }
   0x4   :  { %1648 = vmatpush.msra.mxu2 %v1710_v3  ;;  %v1736_v13 = vsub.f32 %v1269_v0, %v1710_v3  ;;  %v1739_v14 = vsub.f32 %v1268_v1, %v1712_v4  ;;  %v1742_v15 = vsub.f32 %v1267_v2, %v1714_v5  ;;  %1294 = vmatpush.msra.mxu0 %v1710_v3  ;;  %v1745_v16 = vand.u32 4294901760, %v1263_v12  ;;  %v1790_v34 = vld [vmem:[%s2880_s1 + $0x10] sm:$0xff]  ;;  %v1809_v42 = vld [vmem:[%s2878_s2] sm:$0xff] }
   0x5   :  { %v1748_v17 = vsub.f32 %v1266_v6, %v1725_v9  ;;  %v1751_v18 = vsub.f32 %v1265_v7, %v1727_v10  ;;  %v1759_v22 = vsub.f32 %v1264_v8, %v1729_v11  ;;  %v328_v36 = vand.u32 2147483647, %v1780_v29 }
   0x6   :  { %1649 = vmatpush.msra.mxu2 %v1712_v4  ;;  %v1352_v19 = vand.u32 4294901760, %v1736_v13  ;;  %v1358_v20 = vand.u32 4294901760, %v1739_v14  ;;  %v1364_v21 = vand.u32 4294901760, %v1742_v15  ;;  %1296 = vmatpush.msra.mxu0 %v1712_v4  ;;  %v1763_v24 = vsub.f32 %v1263_v12, %v1745_v16 }
   0x7   :  { %v1370_v23 = vand.u32 4294901760, %v1748_v17  ;;  %v1376_v28 = vand.u32 4294901760, %v1751_v18  ;;  %v1382_v33 = vand.u32 4294901760, %v1759_v22  ;;  %v331_v40 = vand.u32 2139095040, %v1780_v29 }
   0x8   :  { %v1353_v25 = vsub.f32 %v1736_v13, %v1352_v19  ;;  %1650 = vmatpush.msra.mxu2 %v1714_v5  ;;  %v1359_v26 = vsub.f32 %v1739_v14, %v1358_v20  ;;  %v1365_v27 = vsub.f32 %v1742_v15, %v1364_v21  ;;  %1298 = vmatpush.msra.mxu0 %v1714_v5  ;;  %v1388_v35 = vand.u32 4294901760, %v1763_v24 }
   0x9   :  { %v1371_v32 = vsub.f32 %v1748_v17, %v1370_v23  ;;  %v1377_v39 = vsub.f32 %v1751_v18, %v1376_v28  ;;  %v950_v41 = vand.u32 2147483647, %v1790_v34  ;;  %v335_v43 = vand.u32 8388607, %v328_v36 }
   0xa   :  { %v1354_v30 = vand.u32 4294901760, %v1353_v25  ;;  %v1360_v31 = vand.u32 4294901760, %v1359_v26  ;;  %1651 = vmatpush.msra.mxu2 %v1725_v9  ;;  %1300 = vmatpush.msra.mxu0 %v1725_v9  ;;  %v1366_v38 = vand.u32 4294901760, %v1365_v27  ;;  %v953_v44 = vand.u32 2139095040, %v1790_v34 }
   0xb   :  { %v1372_v45 = vand.u32 4294901760, %v1371_v32  ;;  %v1383_v46 = vsub.f32 %v1759_v22, %v1382_v33  ;;  %v332_v47 = vshrl.u32 %v331_v40, 23  ;;  %v486_v48 = vand.u32 2139095040, %v1798_v37 }
   0xc   :  { %1656 = vmatpush.msra.mxu3 %v1354_v30  ;;  %1652 = vmatpush.msra.mxu2 %v1727_v10  ;;  %v954_v49 = vshrl.u32 %v953_v44, 23  ;;  %v957_v50 = vand.u32 8388607, %v950_v41  ;;  %v1378_v51 = vand.u32 4294901760, %v1377_v39  ;;  %v1825_v52 = vand.u32 4294901760, %v1809_v42 }
   0xd   :  { %1355 = vmatpush.msra.mxu1 %v1354_v30  ;;  %1302 = vmatpush.msra.mxu0 %v1727_v10  ;;  %v1389_v53 = vsub.f32 %v1763_v24, %v1388_v35  ;;  %v1630_v54 = vadd.s32 4294967169, %v332_v47  ;;  %v336_v55 = vor.u32 8388608, %v335_v43  ;;  %v1384_v57 = vand.u32 4294901760, %v1383_v46 }
   0xe   :  { %1657 = vmatpush.msra.mxu3 %v1360_v31  ;;  %1653 = vmatpush.msra.mxu2 %v1729_v11  ;;  %v1642_v56 = vadd.s32 4294967169, %v954_v49  ;;  %v487_v59 = vshrl.u32 %v486_v48, 23  ;;  %v958_v60 = vor.u32 8388608, %v957_v50  ;;  %v1674_v26 = vmov 683565275  }
   0xf   :  { %1361 = vmatpush.msra.mxu1 %v1360_v31  ;;  %1304 = vmatpush.msra.mxu0 %v1729_v11  ;;  %v338_v58 = vadd.s32 1, %v1630_v54  ;;  %v1390_v62 = vand.u32 4294901760, %v1389_v53  ;;  %v1834_v0 = vshll.u32 %v336_v55, 8  ;;  %v1675_v30 = vmov 2475754826  }
  0x10   :  { %1658 = vmatpush.msra.mxu3 %v1366_v38  ;;  %1654 = vmatpush.msra.mxu2 %v1745_v16  ;;  %v960_v61 = vadd.s32 1, %v1642_v56  ;;  %v1633_v6 = vadd.s32 4294967169, %v487_v59  ;;  %v1843_v12 = vshll.u32 %v958_v60, 8  ;;  %v1676_v32 = vmov 2131351028  }
  0x11   :  { %1367 = vmatpush.msra.mxu1 %v1366_v38  ;;  %1306 = vmatpush.msra.mxu0 %v1745_v16  ;;  %vm339_vm0 = vcmp.gt.s32.totalorder %v338_v58, 0  ;;  %v1678_v39 = vmov 920167782   ;;  %v377_v43 = vand.u32 65535, %v1834_v0  ;;  %v1855_v44 = vshrl.u32 %v1834_v0, 16 }
  0x12   :  { %1659 = vmatpush.msra.mxu3 %v1372_v45  ;;  %1655 = vmatpush.msra.mxu2 %v1825_v52  ;;  %v340_v63 = vsel %vm339_vm0, %v338_v58, 0  ;;  %vm961_vm1 = vcmp.gt.s32.totalorder %v960_v61, 0  ;;  %v1679_v48 = vmov 1326507024  }
  0x13   :  { %1373 = vmatpush.msra.mxu1 %v1372_v45  ;;  %1308 = vmatpush.msra.mxu0 %v1825_v52  ;;  %v342_v1 = vand.u32 31, %v340_v63  ;;  %v962_v2 = vsel %vm961_vm1, %v960_v61, 0  ;;  %v1839_v7 = vshrl.u32 %v340_v63, 5 }
  0x14   :  { %1425 = vmatpush.msrb.mxu2 %v1736_v13  ;;  %1660 = vmatpush.msra.mxu3 %v1378_v51  ;;  %v1841_v8 = vand.u32 31, %v962_v2  ;;  %v1883_v58 = vshrl.u32 %v962_v2, 5 }
  0x15   :  { %1379 = vmatpush.msra.mxu1 %v1378_v51  ;;  %1528 = vmatpush.msrb.mxu0 %v1352_v19  ;;  %v343_v25 = vsub.s32 32, %v342_v1  ;;  %v345_v27 = vshll.u32 %v1674_v26, %v342_v1  ;;  %v348_v31 = vshll.u32 %v1675_v30, %v342_v1  ;;  %v351_v13 = vshll.u32 %v1676_v32, %v342_v1 }
  0x16   :  { %1428 = vmatpush.msrb.mxu2 %v1739_v14  ;;  %1661 = vmatpush.msra.mxu3 %v1384_v57  ;;  %v1677_v19 = vmov 2102212464   ;;  %v357_v40 = vshll.u32 %v1678_v39, %v342_v1  ;;  %vm360_vm2 = vcmp.lt.s32.totalorder %v1839_v7, 1  ;;  %vm363_vm3 = vcmp.lt.s32.totalorder %v1839_v7, 4 }
  0x17   :  { %1385 = vmatpush.msra.mxu1 %v1384_v57  ;;  %1532 = vmatpush.msrb.mxu0 %v1358_v20  ;;  %v354_v38 = vshll.u32 %v1677_v19, %v342_v1  ;;  %v346_v45 = vshrl.u32 %v1675_v30, %v343_v25  ;;  %v349_v46 = vshrl.u32 %v1676_v32, %v343_v25  ;;  %v1861_v20 = vadd.s32 1, %v1633_v6 }
  0x18   :  { %1431 = vmatpush.msrb.mxu2 %v1742_v15  ;;  %1662 = vmatpush.msra.mxu3 %v1390_v62  ;;  %v352_v14 = vshrl.u32 %v1677_v19, %v343_v25  ;;  %v355_v47 = vshrl.u32 %v1678_v39, %v343_v25  ;;  %v358_v49 = vshrl.u32 %v1679_v48, %v343_v25  ;;  %v1871_v54 = vsub.s32 32, %v1841_v8 }
  0x19   :  { %1391 = vmatpush.msra.mxu1 %v1390_v62  ;;  %1536 = vmatpush.msrb.mxu0 %v1364_v21  ;;  %v347_v50 = vor.u32 %v346_v45, %v345_v27  ;;  %v350_v51 = vor.u32 %v349_v46, %v348_v31  ;;  %v344_v15 = vshrl.u32 %v1674_v26, %v343_v25  ;;  %vm362_vm4 = vcmp.lt.s32.totalorder %v1839_v7, 3 }
  0x1a   :  { %1434 = vmatpush.msrb.mxu2 %v1748_v17  ;;  %v353_v53 = vor.u32 %v352_v14, %v351_v13  ;;  %v356_v21 = vor.u32 %v355_v47, %v354_v38  ;;  %v359_v55 = vor.u32 %v358_v49, %v357_v40  ;;  %vm361_vm5 = vcmp.lt.s32.totalorder %v1839_v7, 2 }
  0x1b   :  { %1540 = vmatpush.msrb.mxu0 %v1370_v23  ;;  %v368_v56 = vsel %vm360_vm2, %v347_v50, %v350_v51  ;;  %v967_v59 = vshll.u32 %v1674_v26, %v1841_v8  ;;  %v970_v60 = vshll.u32 %v1675_v30, %v1841_v8  ;;  %v968_v62 = vshrl.u32 %v1675_v30, %v1871_v54 }
  0x1c   :  { %1437 = vmatpush.msrb.mxu2 %v1751_v18  ;;  %v372_v57 = vsel %vm360_vm2, %v350_v51, %v353_v53  ;;  %v369_v17 = vsel %vm363_vm3, %v356_v21, 920167782  ;;  %v373_v23 = vsel %vm363_vm3, %v359_v55, 1326507024  ;;  %v365_v61 = vsel %vm363_vm3, %v353_v53, 2102212464 }
  0x1d   :  { %1544 = vmatpush.msrb.mxu0 %v1376_v28  ;;  %v370_v18 = vsel %vm362_vm4, %v353_v53, %v369_v17  ;;  %v374_v28 = vsel %vm362_vm4, %v356_v21, %v373_v23  ;;  %v364_v63 = vsel %vm360_vm2, %v344_v15, %v347_v50  ;;  %v971_v6 = vshrl.u32 %v1676_v32, %v1871_v54 }
  0x1e   :  { %1440 = vmatpush.msrb.mxu2 %v1759_v22  ;;  %v371_v1 = vsel %vm361_vm5, %v368_v56, %v370_v18  ;;  %v375_v2 = vsel %vm361_vm5, %v372_v57, %v374_v28  ;;  %v366_v22 = vsel %vm362_vm4, %v350_v51, %v365_v61  ;;  %v973_v40 = vshll.u32 %v1676_v32, %v1841_v8 }
  0x1f   :  { %1548 = vmatpush.msrb.mxu0 %v1382_v33  ;;  %v379_v25 = vand.u32 65535, %v375_v2  ;;  %v380_v27 = vshrl.u32 %v375_v2, 16  ;;  %v401_v31 = vand.u32 65535, %v371_v1  ;;  %v402_v13 = vshrl.u32 %v371_v1, 16 }
  0x20   :  { %1443 = vmatpush.msrb.mxu2 %v1763_v24  ;;  %v1918_v33 = vor.u32 %v968_v62, %v967_v59  ;;  %v1920_v38 = vor.u32 %v971_v6, %v970_v60  ;;  %v974_v47 = vshrl.u32 %v1677_v19, %v1871_v54  ;;  %v976_v60 = vshll.u32 %v1677_v19, %v1841_v8 }
  0x21   :  { %1552 = vmatpush.msrb.mxu0 %v1388_v35  ;;  %v381_v45 = vmul.u32 %v379_v25, %v377_v43  ;;  %v382_v46 = vmul.u32 %v380_v27, %v377_v43  ;;  %v383_v14 = vmul.u32 %v379_v25, %v1855_v44  ;;  %v384_v24 = vmul.u32 %v380_v27, %v1855_v44 }
  0x22   :  { %v403_v35 = vmul.u32 %v401_v31, %v377_v43  ;;  %v404_v49 = vmul.u32 %v402_v13, %v377_v43  ;;  %v405_v50 = vmul.u32 %v401_v31, %v1855_v44  ;;  %v406_v21 = vmul.u32 %v402_v13, %v1855_v44 }
  0x23   :  { %v385_v51 = vshll.u32 %v382_v46, 16  ;;  %v386_v53 = vshrl.u32 %v382_v46, 16  ;;  %v387_v15 = vshll.u32 %v383_v14, 16  ;;  %v388_v55 = vshrl.u32 %v383_v14, 16 }
  0x24   :  { %v407_v56 = vshll.u32 %v404_v49, 16  ;;  %v408_v57 = vshrl.u32 %v404_v49, 16  ;;  %v409_v17 = vshll.u32 %v405_v50, 16  ;;  %v410_v59 = vshrl.u32 %v405_v50, 16 }
  0x25   :  { %vm389_vm6 = vc.u32 %v381_v45, %v385_v51  ;;  %v391_v23 = vadd.s32 %v385_v51, %v381_v45  ;;  %v1680_v61 = vmov 0   ;;  %v977_v28 = vshrl.u32 %v1678_v39, %v1871_v54 }
  0x26   :  { %v390_v43 = vsel %vm389_vm6, 1, %v1680_v61  ;;  %vm411_vm7 = vc.u32 %v403_v35, %v407_v56  ;;  %v413_v18 = vadd.s32 %v407_v56, %v403_v35  ;;  %v979_v1 = vshll.u32 %v1678_v39, %v1841_v8 }
  0x27   :  { %v392_v62 = vadd.s32 %v390_v43, %v384_v24  ;;  %vm393_vm8 = vc.u32 %v391_v23, %v387_v15  ;;  %v412_v44 = vsel %vm411_vm7, 1, %v1680_v61  ;;  %v975_v25 = vor.u32 %v974_v47, %v973_v40 }
  0x28   :  { %v394_v2 = vsel %vm393_vm8, 1, %v1680_v61  ;;  %v414_v6 = vadd.s32 %v412_v44, %v406_v21  ;;  %vm415_vm9 = vc.u32 %v413_v18, %v409_v17  ;;  %v978_v13 = vor.u32 %v977_v28, %v976_v60 }
  0x29   :  { %v396_v27 = vadd.s32 %v394_v2, %v392_v62  ;;  %v416_v31 = vsel %vm415_vm9, 1, %v1680_v61  ;;  %v980_v45 = vshrl.u32 %v1679_v48, %v1871_v54  ;;  %v1942_v46 = vadd.s32 %v413_v18, %v409_v17 }
  0x2a   :  { %v418_v14 = vadd.s32 %v416_v31, %v414_v6  ;;  %vm982_vm10 = vcmp.lt.s32.totalorder %v1883_v58, 1  ;;  %vm984_vm11 = vcmp.lt.s32.totalorder %v1883_v58, 3  ;;  %vm983_vm12 = vcmp.lt.s32.totalorder %v1883_v58, 2 }
  0x2b   :  { %v397_v8 = vadd.s32 %v396_v27, %v386_v53  ;;  %v981_v24 = vor.u32 %v980_v45, %v979_v1  ;;  %vm985_vm13 = vcmp.lt.s32.totalorder %v1883_v58, 4  ;;  %v367_v40 = vsel %vm361_vm5, %v364_v63, %v366_v22 }
  0x2c   :  { %v419_v47 = vadd.s32 %v418_v14, %v408_v57  ;;  %v990_v35 = vsel %vm982_vm10, %v1918_v33, %v1920_v38  ;;  %v991_v49 = vsel %vm985_vm13, %v978_v13, 920167782  ;;  %v994_v53 = vsel %vm982_vm10, %v1920_v38, %v975_v25 }
  0x2d   :  { %v1956_v50 = vadd.s32 %v397_v8, %v388_v55  ;;  %v992_v51 = vsel %vm984_vm11, %v975_v25, %v991_v49  ;;  %v999_v7 = vand.u32 65535, %v1843_v12  ;;  %v995_v15 = vsel %vm985_vm13, %v981_v24, 1326507024 }
  0x2e   :  { %v420_v63 = vadd.s32 %v419_v47, %v410_v59  ;;  %v993_v22 = vsel %vm983_vm12, %v990_v35, %v992_v51  ;;  %v1000_v21 = vshrl.u32 %v1843_v12, 16  ;;  %v421_v55 = vmul.u32 %v1834_v0, %v367_v40 }
  0x2f   :  { %vm423_vm14 = vc.u32 %v1956_v50, %v1942_v46  ;;  %v996_v56 = vsel %vm984_vm11, %v978_v13, %v995_v15  ;;  %v1023_v57 = vand.u32 65535, %v993_v22  ;;  %v1024_v59 = vshrl.u32 %v993_v22, 16 }
  0x30   :  { %v424_v17 = vadd.s32 1, %v420_v63  ;;  %v997_v23 = vsel %vm983_vm12, %v994_v53, %v996_v56  ;;  %vm494_vm15 = vcmp.gt.s32.totalorder %v1861_v20, 0  ;;  %v966_v0 = vshrl.u32 %v1674_v26, %v1871_v54 }
  0x31   :  { %v1001_v60 = vand.u32 65535, %v997_v23  ;;  %v1002_v43 = vshrl.u32 %v997_v23, 16  ;;  %v1026_v28 = vmul.u32 %v1024_v59, %v999_v7  ;;  %v1027_v62 = vmul.u32 %v1023_v57, %v1000_v21 }
  0x32   :  { %v425_v18 = vsel %vm423_vm14, %v424_v17, %v420_v63  ;;  %v1025_v6 = vmul.u32 %v1023_v57, %v999_v7  ;;  %v495_v13 = vsel %vm494_vm15, %v1861_v20, 0  ;;  %v987_v14 = vsel %vm985_vm13, %v975_v25, 2102212464 }
  0x33   :  { %v426_v44 = vadd.s32 %v425_v18, %v421_v55  ;;  %v1003_v1 = vmul.u32 %v1001_v60, %v999_v7  ;;  %v1004_v2 = vmul.u32 %v1002_v43, %v999_v7  ;;  %v1005_v27 = vmul.u32 %v1001_v60, %v1000_v21 }
  0x34   :  { %v1029_v31 = vshll.u32 %v1026_v28, 16  ;;  %v1006_v8 = vmul.u32 %v1002_v43, %v1000_v21  ;;  %v986_v54 = vsel %vm982_vm10, %v966_v0, %v1918_v33  ;;  %v1028_v47 = vmul.u32 %v1024_v59, %v1000_v21 }
  0x35   :  { %v427_v45 = vadd.s32 536870912, %v426_v44  ;;  %v1007_v24 = vshll.u32 %v1004_v2, 16  ;;  %v1009_v40 = vshll.u32 %v1005_v27, 16  ;;  %v1031_v35 = vshll.u32 %v1027_v62, 16 }
  0x36   :  { %vm1033_vm1 = vc.u32 %v1025_v6, %v1029_v31  ;;  %v988_v20 = vsel %vm984_vm11, %v1920_v38, %v987_v14  ;;  %v1035_v7 = vadd.s32 %v1029_v31, %v1025_v6  ;;  %v1008_v33 = vshrl.u32 %v1004_v2, 16 }
  0x37   :  { %v1985_v49 = vshrl.u32 %v427_v45, 30  ;;  %vm1011_vm0 = vc.u32 %v1003_v1, %v1007_v24  ;;  %v1013_v51 = vadd.s32 %v1007_v24, %v1003_v1  ;;  %v1034_v53 = vsel %vm1033_vm1, 1, %v1680_v61 }
  0x38   :  { %v1012_v25 = vsel %vm1011_vm0, 1, %v1680_v61  ;;  %v1030_v21 = vshrl.u32 %v1026_v28, 16  ;;  %v1036_v55 = vadd.s32 %v1034_v53, %v1028_v47  ;;  %vm1037_vm3 = vc.u32 %v1035_v7, %v1031_v35 }
  0x39   :  { %v429_v63 = vshll.u32 %v1985_v49, 30  ;;  %v1014_v22 = vadd.s32 %v1012_v25, %v1006_v8  ;;  %vm1015_vm2 = vc.u32 %v1013_v51, %v1009_v40  ;;  %v1010_v57 = vshrl.u32 %v1005_v27, 16 }
  0x3a   :  { %v1016_v15 = vsel %vm1015_vm2, 1, %v1680_v61  ;;  %v1038_v38 = vsel %vm1037_vm3, 1, %v1680_v61  ;;  %v1032_v23 = vshrl.u32 %v1027_v62, 16  ;;  %v483_v60 = vand.u32 2147483647, %v1798_v37 }
  0x3b   :  { %v430_v56 = vsub.s32 %v426_v44, %v429_v63  ;;  %v1018_v17 = vadd.s32 %v1016_v15, %v1014_v22  ;;  %v1040_v59 = vadd.s32 %v1038_v38, %v1036_v55  ;;  %v497_v43 = vand.u32 31, %v495_v13 }
  0x3c   :  { %v1996_v1 = vadd.s32 %v1035_v7, %v1031_v35  ;;  %v989_v28 = vsel %vm983_vm12, %v986_v54, %v988_v20  ;;  %v422_v45 = vadd.s32 %v1942_v46, %v1956_v50  ;;  %v490_v58 = vand.u32 8388607, %v483_v60 }
  0x3d   :  { %vm431_vm4 = vcmp.lt.s32.totalorder %v430_v56, 0  ;;  %v432_v18 = vsub.s32 0, %v430_v56  ;;  %v1019_v0 = vadd.s32 %v1018_v17, %v1008_v33  ;;  %v1041_v2 = vadd.s32 %v1040_v59, %v1030_v21 }
  0x3e   :  { %v2002_v27 = vsub.s32 32, %v497_v43  ;;  %v1043_v14 = vmul.u32 %v1843_v12, %v989_v28  ;;  %v2011_v54 = vshrl.u32 %v495_v13, 5  ;;  %v500_v40 = vshll.u32 %v1674_v26, %v497_v43 }
  0x3f   :  { %v433_v6 = vsel %vm431_vm4, %v432_v18, %v430_v56  ;;  %v2000_v44 = vadd.s32 %v1019_v0, %v1010_v57  ;;  %v1042_v62 = vadd.s32 %v1041_v2, %v1032_v23  ;;  %v503_v47 = vshll.u32 %v1675_v30, %v497_v43 }
  0x40   :  { %v434_v31 = vclz %v433_v6  ;;  %v506_v35 = vshll.u32 %v1676_v32, %v497_v43  ;;  %v509_v46 = vshll.u32 %v1677_v19, %v497_v43  ;;  %v510_v12 = vshrl.u32 %v1678_v39, %v2002_v27 }
  0x41   :  { %vm1045_vm5 = vc.u32 %v2000_v44, %v1996_v1  ;;  %v1046_v24 = vadd.s32 1, %v1042_v62  ;;  %v501_v51 = vshrl.u32 %v1675_v30, %v2002_v27  ;;  %v504_v13 = vshrl.u32 %v1676_v32, %v2002_v27 }
  0x42   :  { %v1631_v8 = vadd.s32 4294967294, %v434_v31  ;;  %v507_v53 = vshrl.u32 %v1677_v19, %v2002_v27  ;;  %v512_v7 = vshll.u32 %v1678_v39, %v497_v43  ;;  %v513_v15 = vshrl.u32 %v1679_v48, %v2002_v27 }
  0x43   :  { %v1047_v50 = vsel %vm1045_vm5, %v1046_v24, %v1042_v62  ;;  %v491_v55 = vor.u32 8388608, %v490_v58  ;;  %v511_v57 = vor.u32 %v510_v12, %v509_v46  ;;  %v2028_v23 = vor.u32 %v501_v51, %v500_v40 }
  0x44   :  { %vm1632_vm6 = vcmp.lt.s32.totalorder %v1631_v8, 0  ;;  %v1048_v25 = vadd.s32 %v1047_v50, %v1043_v14  ;;  %v2030_v59 = vor.u32 %v504_v13, %v503_v47  ;;  %v508_v0 = vor.u32 %v507_v53, %v506_v35 }
  0x45   :  { %v437_v20 = vsel %vm1632_vm6, 0, %v1631_v8  ;;  %vm515_vm7 = vcmp.lt.s32.totalorder %v2011_v54, 1  ;;  %vm518_vm8 = vcmp.lt.s32.totalorder %v2011_v54, 4  ;;  %v514_v28 = vor.u32 %v513_v15, %v512_v7 }
  0x46   :  { %v438_v63 = vsub.s32 32, %v437_v20  ;;  %v439_v33 = vshll.u32 %v430_v56, %v437_v20  ;;  %v442_v22 = vsub.s32 4294967266, %v437_v20  ;;  %v1049_v21 = vadd.s32 536870912, %v1048_v25 }
  0x47   :  { %vm517_vm9 = vcmp.lt.s32.totalorder %v2011_v54, 3  ;;  %v452_v2 = vsub.s32 4, %v1985_v49  ;;  %v524_v31 = vsel %vm518_vm8, %v511_v57, 920167782  ;;  %vm516_vm10 = vcmp.lt.s32.totalorder %v2011_v54, 2 }
  0x48   :  { %v440_v17 = vshrl.u32 %v422_v45, %v438_v63  ;;  %v443_v38 = vadd.s32 127, %v442_v22  ;;  %v2032_v18 = vshrl.u32 %v1049_v21, 30  ;;  %v2042_v14 = vshll.u32 %v491_v55, 8 }
  0x49   :  { %v523_v8 = vsel %vm515_vm7, %v2028_v23, %v2030_v59  ;;  %v525_v24 = vsel %vm517_vm9, %v508_v0, %v524_v31  ;;  %v527_v40 = vsel %vm515_vm7, %v2030_v59, %v508_v0  ;;  %vm330_vm11 = vcmp.lt.s32.totalorder %v1780_v29, 0 }
  0x4a   :  { %v441_v56 = vor.u32 %v440_v17, %v439_v33  ;;  %v444_v43 = vshll.u32 %v443_v38, 23  ;;  %v1051_v6 = vshll.u32 %v2032_v18, 30  ;;  %v528_v35 = vsel %vm518_vm8, %v514_v28, 1326507024 }
  0x4b   :  { %v453_v46 = vsel %vm330_vm11, %v452_v2, %v1985_v49  ;;  %v529_v50 = vsel %vm517_vm9, %v511_v57, %v528_v35  ;;  %v526_v13 = vsel %vm516_vm10, %v523_v8, %v525_v24  ;;  %v533_v7 = vshrl.u32 %v2042_v14, 16 }
  0x4c   :  { %v445_v62 = vor.u32 4788187, %v444_v43  ;;  %v448_v45 = vcvt.s32.f32 %v441_v56  ;;  %v1052_v58 = vsub.s32 %v1048_v25, %v1051_v6  ;;  %v530_v20 = vsel %vm516_vm10, %v527_v40, %v529_v50 }
  0x4d   :  { %v532_v25 = vand.u32 65535, %v2042_v14  ;;  %v534_v63 = vand.u32 65535, %v530_v20  ;;  %v535_v33 = vshrl.u32 %v530_v20, 16  ;;  %vm329_vm13 = vcmp.le.f32.partialorder %v328_v36, 0.7853982 }
  0x4e   :  { %v446_v47 = vand.u32 2147483647, %v445_v62  ;;  %vm1053_vm12 = vcmp.lt.s32.totalorder %v1052_v58, 0  ;;  %v1054_v12 = vsub.s32 0, %v1052_v58  ;;  %v455_v15 = vsel %vm329_vm13, 0, %v453_v46 }
  0x4f   :  { %v536_v21 = vmul.u32 %v534_v63, %v532_v25  ;;  %v2069_v55 = vmul.u32 %v535_v33, %v532_v25  ;;  %v557_v57 = vshrl.u32 %v526_v13, 16  ;;  %v499_v56 = vshrl.u32 %v1674_v26, %v2002_v27 }
  0x50   :  { %v449_v51 = vmul.f32 %v448_v45, %v446_v47  ;;  %v1055_v53 = vsel %vm1053_vm12, %v1054_v12, %v1052_v58  ;;  %v1044_v36 = vadd.s32 %v1996_v1, %v2000_v44  ;;  %v2080_v28 = vmul.u32 %v534_v63, %v533_v7 }
  0x51   :  { %v1056_v22 = vclz %v1055_v53  ;;  %v540_v2 = vshll.u32 %v2069_v55, 16  ;;  %v472_v31 = vadd.s32 3, %v455_v15  ;;  %v556_v62 = vand.u32 65535, %v526_v13 }
  0x52   :  { %v450_v49 = vxor.u32 2147483648, %v449_v51  ;;  %v539_v8 = vmul.u32 %v535_v33, %v533_v7  ;;  %v2085_v27 = vmul.u32 %v557_v57, %v532_v25  ;;  %vm952_vm0 = vcmp.lt.s32.totalorder %v1790_v34, 0 }
  0x53   :  { %v1643_v38 = vadd.s32 4294967294, %v1056_v22  ;;  %vm544_vm15 = vc.u32 %v536_v21, %v540_v2  ;;  %v520_v44 = vsel %vm518_vm8, %v508_v0, 2102212464  ;;  %v542_v46 = vshll.u32 %v2080_v28, 16 }
  0x54   :  { %v451_v17 = vsel %vm330_vm11, %v450_v49, %v449_v51  ;;  %v545_v12 = vsel %vm544_vm15, 1, %v1680_v61  ;;  %v2092_v20 = vmul.u32 %v556_v62, %v533_v7  ;;  %v546_v63 = vadd.s32 %v540_v2, %v536_v21 }
  0x55   :  { %v2076_v43 = vsel %vm329_vm13, %v1780_v29, %v451_v17  ;;  %vm1644_vm14 = vcmp.lt.s32.totalorder %v1643_v38, 0  ;;  %v547_v33 = vadd.s32 %v545_v12, %v539_v8  ;;  %v558_v49 = vmul.u32 %v556_v62, %v532_v25 }
  0x56   :  { %v456_v6 = vmul.f32 %v2076_v43, %v2076_v43  ;;  %v1059_v45 = vsel %vm1644_vm14, 0, %v1643_v38  ;;  %vm2096_vm1 = vcmp.le.f32.partialorder %v950_v41, 0.7853982  ;;  %v562_v17 = vshll.u32 %v2085_v27, 16 }
  0x57   :  { %v1060_v47 = vsub.s32 32, %v1059_v45  ;;  %v1061_v35 = vshll.u32 %v1052_v58, %v1059_v45  ;;  %v1064_v1 = vsub.s32 4294967266, %v1059_v45  ;;  %v541_v45 = vshrl.u32 %v2069_v55, 16 }
  0x58   :  { %v457_v24 = vmul.f32 -0.001358992, %v456_v6  ;;  %v464_v40 = vmul.f32 -0.00019511016, %v456_v6  ;;  %vm548_vm2 = vc.u32 %v546_v63, %v542_v46  ;;  %v561_v25 = vmul.u32 %v557_v57, %v533_v7 }
  0x59   :  { %v1062_v13 = vshrl.u32 %v1044_v36, %v1060_v47  ;;  %v1065_v53 = vadd.s32 127, %v1064_v1  ;;  %v1074_v36 = vsub.s32 4, %v2032_v18  ;;  %v564_v62 = vshll.u32 %v2092_v20, 16 }
  0x5a   :  { %v458_v50 = vadd.f32 0.041655596, %v457_v24  ;;  %v465_v51 = vadd.f32 0.008332121, %v464_v40  ;;  %v549_v41 = vsel %vm548_vm2, 1, %v1680_v61  ;;  %vm566_vm3 = vc.u32 %v558_v49, %v562_v17  ;;  %v2108_v40 = vld [vmem:[%s2880_s1 + $0x18] sm:$0xff] }
  0x5b   :  { %v1063_v0 = vor.u32 %v1062_v13, %v1061_v35  ;;  %v1066_v38 = vshll.u32 %v1065_v53, 23  ;;  %v2110_v35 = vand.u32 3, %v472_v31  ;;  %v551_v55 = vadd.s32 %v549_v41, %v547_v33 }
  0x5c   :  { %v459_v58 = vmul.f32 %v458_v50, %v456_v6  ;;  %v466_v22 = vmul.f32 %v465_v51, %v456_v6  ;;  %v567_v1 = vsel %vm566_vm3, 1, %v1680_v61  ;;  %v519_v7 = vsel %vm515_vm7, %v499_v56, %v2028_v23 }
  0x5d   :  { %v1067_v8 = vor.u32 4788187, %v1066_v38  ;;  %v1070_v24 = vcvt.s32.f32 %v1063_v0  ;;  %v521_v57 = vsel %vm517_vm9, %v2030_v59, %v520_v44  ;;  %v568_v12 = vadd.s32 %v562_v17, %v558_v49 }
  0x5e   :  { %v460_v21 = vadd.f32 -0.4999988, %v459_v58  ;;  %v467_v2 = vadd.f32 -0.16666654, %v466_v22  ;;  %v1075_v51 = vsel %vm952_vm0, %v1074_v36, %v2032_v18  ;;  %v569_v31 = vadd.s32 %v567_v1, %v561_v25 }
  0x5f   :  { %v1068_v46 = vand.u32 2147483647, %v1067_v8  ;;  %v1107_v13 = vand.u32 2139095040, %v2108_v40  ;;  %v543_v63 = vshrl.u32 %v2080_v28, 16  ;;  %v552_v33 = vadd.s32 %v551_v55, %v541_v45 }
  0x60   :  { %v468_v47 = vmul.f32 %v467_v2, %v456_v6  ;;  %v461_v50 = vmul.f32 %v460_v21, %v456_v6  ;;  %vm570_vm4 = vc.u32 %v568_v12, %v564_v62  ;;  %v1393_v23 = vsub.f32 %v1809_v42, %v1825_v52 }
  0x61   :  { %v1071_v53 = vmul.f32 %v1070_v24, %v1068_v46  ;;  %v522_v59 = vsel %vm516_vm10, %v519_v7, %v521_v57  ;;  %v563_v56 = vshrl.u32 %v2085_v27, 16  ;;  %v1077_v18 = vsel %vm2096_vm1, 0, %v1075_v51 }
  0x62   :  { %v469_v58 = vadd.f32 1.0, %v468_v47  ;;  %v571_v44 = vsel %vm570_vm4, 1, %v1680_v61  ;;  %v1108_v49 = vshrl.u32 %v1107_v13, 23  ;;  %v462_v22 = vadd.f32 1.0, %v461_v50  ;;  %1446 = vmatpush.msrb.mxu2 %v1393_v23 }
  0x63   :  { %v1072_v6 = vxor.u32 2147483648, %v1071_v53  ;;  %v1394_v28 = vand.u32 4294901760, %v1393_v23  ;;  %v565_v0 = vshrl.u32 %v2092_v20, 16  ;;  %v573_v17 = vadd.s32 %v571_v44, %v569_v31 }
  0x64   :  { %v2135_v54 = vadd.s32 %v552_v33, %v543_v63  ;;  %v2137_v38 = vadd.s32 %v568_v12, %v564_v62  ;;  %v1645_v27 = vadd.s32 4294967169, %v1108_v49  ;;  %v470_v36 = vmul.f32 %v469_v58, %v2076_v43 }
  0x65   :  { %v1073_v42 = vsel %vm952_vm0, %v1072_v6, %v1071_v53  ;;  %v1395_v21 = vsub.f32 %v1393_v23, %v1394_v28  ;;  %v574_v2 = vadd.s32 %v573_v17, %v563_v56  ;;  %1556 = vmatpush.msrb.mxu0 %v1394_v28  ;;  %vm475_vm5 = vcmp.eq.s32.totalorder %v2110_v35, 0 }
  0x66   :  { %v2143_v45 = vsel %vm2096_vm1, %v1790_v34, %v1073_v42  ;;  %v576_v25 = vmul.u32 %v2042_v14, %v522_v59  ;;  %v1114_v62 = vadd.s32 1, %v1645_v27  ;;  %v2149_v8 = vand.u32 3, %v1077_v18 }
  0x67   :  { %v1078_v20 = vmul.f32 %v2143_v45, %v2143_v45  ;;  %v1396_v24 = vand.u32 4294901760, %v1395_v21  ;;  %v575_v43 = vadd.s32 %v574_v2, %v565_v0  ;;  %v1104_v41 = vand.u32 2147483647, %v2108_v40 }
  0x68   :  { %vm578_vm6 = vc.u32 %v2135_v54, %v2137_v38  ;;  %vm1115_vm7 = vcmp.gt.s32.totalorder %v1114_v62, 0  ;;  %v476_v55 = vxor.u32 2147483648, %v470_v36  ;;  %v479_v1 = vxor.u32 2147483648, %v462_v22 }
  0x69   :  { %v1079_v15 = vmul.f32 -0.001358992, %v1078_v20  ;;  %v1086_v47 = vmul.f32 -0.00019511016, %v1078_v20  ;;  %1663 = vmatpush.msra.mxu3 %v1396_v24  ;;  %v579_v46 = vadd.s32 1, %v575_v43  ;;  %v1116_v7 = vsel %vm1115_vm7, %v1114_v62, 0  ;;  %1397 = vmatpush.msra.mxu1 %v1396_v24 }
  0x6a   :  { %vm478_vm8 = vcmp.eq.s32.totalorder %v2110_v35, 2  ;;  %v1118_v12 = vand.u32 31, %v1116_v7  ;;  %vm474_vm9 = vcmp.lt.s32.totalorder %v2110_v35, 2  ;;  %v2160_v51 = vand.u32 8388607, %v1104_v41 }
  0x6b   :  { %v1080_v14 = vadd.f32 0.041655596, %v1079_v15  ;;  %v1087_v57 = vadd.f32 0.008332121, %v1086_v47  ;;  %1477 = vmatpush.msrb.mxu3 %v1710_v3  ;;  %1583 = vmatpush.msrb.mxu1 %v1710_v3  ;;  %v580_v50 = vsel %vm578_vm6, %v579_v46, %v575_v43  ;;  %vm471_vm10 = vweird.f32 %v1780_v29 }
  0x6c   :  { %v581_v53 = vadd.s32 %v580_v50, %v576_v25  ;;  %v2164_v63 = vsub.s32 32, %v1118_v12  ;;  %v477_v3 = vsel %vm475_vm5, %v462_v22, %v476_v55  ;;  %v480_v33 = vsel %vm478_vm8, %v479_v1, %v470_v36 }
  0x6d   :  { %v1081_v31 = vmul.f32 %v1080_v14, %v1078_v20  ;;  %v1088_v13 = vmul.f32 %v1087_v57, %v1078_v20  ;;  %1479 = vmatpush.msrb.mxu3 %v1712_v4  ;;  %1585 = vmatpush.msrb.mxu1 %v1712_v4  ;;  %vm1096_vm11 = vcmp.eq.s32.totalorder %v2149_v8, 0  ;;  %v1121_v58 = vshll.u32 %v1674_v26, %v1118_v12 }
  0x6e   :  { %v1124_v23 = vshll.u32 %v1675_v30, %v1118_v12  ;;  %vm1095_vm12 = vcmp.lt.s32.totalorder %v2149_v8, 2  ;;  %v582_v6 = vadd.s32 536870912, %v581_v53  ;;  %v1127_v4 = vshll.u32 %v1676_v32, %v1118_v12 }
  0x6f   :  { %v1082_v59 = vadd.f32 -0.4999988, %v1081_v31  ;;  %v1089_v56 = vadd.f32 -0.16666654, %v1088_v13  ;;  %1481 = vmatpush.msrb.mxu3 %v1714_v5  ;;  %1587 = vmatpush.msrb.mxu1 %v1714_v5  ;;  %vm1093_vm13 = vweird.f32 %v1790_v34  ;;  %v1122_v18 = vshrl.u32 %v1675_v30, %v2164_v63  ;;  %v2251_v13 = vld [vmem:[%s2879_s0] sm:$0xff] }
  0x70   :  { %v1125_v44 = vshrl.u32 %v1676_v32, %v2164_v63  ;;  %v1130_v49 = vshll.u32 %v1677_v19, %v1118_v12  ;;  %v1131_v22 = vshrl.u32 %v1678_v39, %v2164_v63  ;;  %v2186_v17 = vshrl.u32 %v582_v6, 30 }
  0x71   :  { %v1083_v28 = vmul.f32 %v1082_v59, %v1078_v20  ;;  %v1090_v0 = vmul.f32 %v1089_v56, %v1078_v20  ;;  %v1128_v5 = vshrl.u32 %v1677_v19, %v2164_v63  ;;  %1483 = vmatpush.msrb.mxu3 %v1725_v9  ;;  %1589 = vmatpush.msrb.mxu1 %v1725_v9  ;;  %vm1099_vm14 = vcmp.eq.s32.totalorder %v2149_v8, 2 }
  0x72   :  { %v1112_v42 = vor.u32 8388608, %v2160_v51  ;;  %v2194_v27 = vshrl.u32 %v1116_v7, 5  ;;  %v1133_v36 = vshll.u32 %v1678_v39, %v1118_v12  ;;  %v481_v21 = vsel %vm474_vm9, %v477_v3, %v480_v33 }
  0x73   :  { %v1084_v2 = vadd.f32 1.0, %v1083_v28  ;;  %v1091_v20 = vadd.f32 1.0, %v1090_v0  ;;  %v584_v25 = vshll.u32 %v2186_v17, 30  ;;  %1485 = vmatpush.msrb.mxu3 %v1727_v10  ;;  %1591 = vmatpush.msrb.mxu1 %v1727_v10  ;;  %v2202_v9 = vor.u32 %v1122_v18, %v1121_v58 }
  0x74   :  { %v2204_v62 = vor.u32 %v1125_v44, %v1124_v23  ;;  %v1132_v24 = vor.u32 %v1131_v22, %v1130_v49  ;;  %v1134_v43 = vshrl.u32 %v1679_v48, %v2164_v63  ;;  %v2211_v55 = vor.u32 %v1128_v5, %v1127_v4 }
  0x75   :  { %v1092_v15 = vmul.f32 %v1091_v20, %v2143_v45  ;;  %v1100_v35 = vxor.u32 2147483648, %v1084_v2  ;;  %v2209_v47 = vsub.s32 %v581_v53, %v584_v25  ;;  %1487 = vmatpush.msrb.mxu3 %v1729_v11  ;;  %1593 = vmatpush.msrb.mxu1 %v1729_v11  ;;  %vm1136_vm15 = vcmp.lt.s32.totalorder %v2194_v27, 1 }
  0x76   :  { %v1135_v10 = vor.u32 %v1134_v43, %v1133_v36  ;;  %vm1138_vm0 = vcmp.lt.s32.totalorder %v2194_v27, 3  ;;  %vm1139_vm1 = vcmp.lt.s32.totalorder %v2194_v27, 4  ;;  %v482_v11 = vsel %vm471_vm10, nan, %v481_v21 }
  0x77   :  { %v1097_v1 = vxor.u32 2147483648, %v1092_v15  ;;  %v1101_v45 = vsel %vm1099_vm14, %v1100_v35, %v1092_v15  ;;  %vm586_vm2 = vcmp.lt.s32.totalorder %v2209_v47, 0  ;;  %v587_v46 = vsub.s32 0, %v2209_v47  ;;  %1489 = vmatpush.msrb.mxu3 %v1745_v16  ;;  %1595 = vmatpush.msrb.mxu1 %v1745_v16  ;;  %v2281_v15 = vld [vmem:[%s2879_s0 + $0x18] sm:$0xff] }
  0x78   :  { %vm1137_vm3 = vcmp.lt.s32.totalorder %v2194_v27, 2  ;;  %v1145_v7 = vsel %vm1139_vm1, %v1132_v24, 920167782  ;;  %v2229_v14 = vshll.u32 %v1112_v42, 8  ;;  %v1144_v16 = vsel %vm1136_vm15, %v2202_v9, %v2204_v62 }
  0x79   :  { %v1098_v57 = vsel %vm1096_vm11, %v1084_v2, %v1097_v1  ;;  %v588_v12 = vsel %vm586_vm2, %v587_v46, %v2209_v47  ;;  %v1146_v29 = vsel %vm1138_vm0, %v2211_v55, %v1145_v7  ;;  %1491 = vmatpush.msrb.mxu3 %v1825_v52  ;;  %v1148_v31 = vsel %vm1136_vm15, %v2204_v62, %v2211_v55 }
  0x7a   :  { %v1102_v50 = vsel %vm1095_vm12, %v1098_v57, %v1101_v45  ;;  %v589_v51 = vclz %v588_v12  ;;  %1597 = vmatpush.msrb.mxu1 %v1825_v52  ;;  %vm1272_vm4 = vcmask 523264   ;;  %v1149_v8 = vsel %vm1139_vm1, %v1135_v10, 1326507024 }
  0x7b   :  { %v1103_v53 = vsel %vm1093_vm13, nan, %v1102_v50  ;;  %v1147_v58 = vsel %vm1137_vm3, %v1144_v16, %v1146_v29  ;;  %v1150_v23 = vsel %vm1138_vm0, %v1132_v24, %v1149_v8  ;;  %v577_v59 = vadd.s32 %v2137_v38, %v2135_v54 }
  0x7c   :  { %v1260_v3 = vadd.f32 %v1103_v53, %v482_v11  ;;  %v1634_v33 = vadd.s32 4294967294, %v589_v51  ;;  %v1151_v52 = vsel %vm1137_vm3, %v1148_v31, %v1150_v23  ;;  %v1153_v34 = vand.u32 65535, %v2229_v14 }
  0x7d   :  { %v21_v56 = vand.u32 2139095040, %v2251_v13  ;;  %v1154_v4 = vshrl.u32 %v2229_v14, 16  ;;  %v1155_v18 = vand.u32 65535, %v1151_v52  ;;  %v1156_v22 = vshrl.u32 %v1151_v52, 16 }
  0x7e   :  { %v1280_v6 = vsel %vm1272_vm4, %v1260_v3, 0  ;;  %vm1635_vm5 = vcmp.lt.s32.totalorder %v1634_v33, 0  ;;  %v1178_v28 = vshrl.u32 %v1147_v58, 16  ;;  %v1177_v36 = vand.u32 65535, %v1147_v58 }
  0x7f   :  { %v2270_v44 = vand.u32 4294901760, %v1280_v6  ;;  %v592_v49 = vsel %vm1635_vm5, 0, %v1634_v33  ;;  %v1157_v42 = vmul.u32 %v1155_v18, %v1153_v34  ;;  %v22_v21 = vshrl.u32 %v21_v56, 23 }
  0x80   :  { %v593_v0 = vsub.s32 32, %v592_v49  ;;  %v594_v54 = vshll.u32 %v2209_v47, %v592_v49  ;;  %v597_v38 = vsub.s32 4294967266, %v592_v49  ;;  %v1158_v25 = vmul.u32 %v1156_v22, %v1153_v34 }
  0x81   :  { %v2274_v5 = vsub.f32 %v1280_v6, %v2270_v44  ;;  %1407 = vmatmul.f32.vlgmr.msra.gmra.mxu3 %v2270_v44  ;;  %v1159_v24 = vmul.u32 %v1155_v18, %v1154_v4  ;;  %vm485_vm6 = vcmp.lt.s32.totalorder %v2281_v15, 0  ;;  %v607_v35 = vsub.s32 4, %v2186_v17 }
  0x82   :  { %v595_v2 = vshrl.u32 %v577_v59, %v593_v0  ;;  %v598_v20 = vadd.s32 127, %v597_v38  ;;  %v1120_v47 = vshrl.u32 %v1674_v26, %v2164_v63  ;;  %v1180_v10 = vmul.u32 %v1178_v28, %v1153_v34 }
  0x83   :  { %v1327_v43 = vand.u32 4294901760, %v2274_v5  ;;  %vm2289_vm7 = vcmp.le.f32.partialorder %v483_v60, 0.7853982  ;;  %v1160_v11 = vmul.u32 %v1156_v22, %v1154_v4  ;;  %v1161_v7 = vshll.u32 %v1158_v25, 16 }
  0x84   :  { %v596_v45 = vor.u32 %v595_v2, %v594_v54  ;;  %v599_v46 = vshll.u32 %v598_v20, 23  ;;  %v1163_v12 = vshll.u32 %v1159_v24, 16  ;;  %v1179_v16 = vmul.u32 %v1177_v36, %v1153_v34 }
  0x85   :  { %v1328_v57 = vsub.f32 %v2274_v5, %v1327_v43  ;;  %v1181_v29 = vmul.u32 %v1177_v36, %v1154_v4  ;;  %vm1165_vm8 = vc.u32 %v1157_v42, %v1161_v7  ;;  %v1167_v51 = vadd.s32 %v1161_v7, %v1157_v42 }
  0x86   :  { %v600_v50 = vor.u32 4788187, %v599_v46  ;;  %v603_v63 = vcvt.s32.f32 %v596_v45  ;;  %v1166_v60 = vsel %vm1165_vm8, 1, %v1680_v61  ;;  %v1182_v31 = vmul.u32 %v1178_v28, %v1154_v4 }
  0x87   :  { %v1329_v37 = vand.u32 4294901760, %v1328_v57  ;;  %v1183_v53 = vshll.u32 %v1180_v10, 16  ;;  %v1162_v3 = vshrl.u32 %v1158_v25, 16  ;;  %v1168_v33 = vadd.s32 %v1166_v60, %v1160_v11 }
  0x88   :  { %v601_v8 = vand.u32 2147483647, %v600_v50  ;;  %vm1169_vm9 = vc.u32 %v1167_v51, %v1163_v12  ;;  %v1141_v58 = vsel %vm1139_vm1, %v2211_v55, 2102212464  ;;  %v1185_v59 = vshll.u32 %v1181_v29, 16 }
  0x89   :  { %1330 = vmatmul.f32.vlgmr.msra.gmra.mxu2 %v1329_v37  ;;  %v1170_v23 = vsel %vm1169_vm9, 1, %v1680_v61  ;;  %vm1187_vm10 = vc.u32 %v1179_v16, %v1183_v53  ;;  %v1189_v6 = vadd.s32 %v1183_v53, %v1179_v16  ;;  %v1164_v4 = vshrl.u32 %v1159_v24, 16 }
  0x8a   :  { %v604_v52 = vmul.f32 %v603_v63, %v601_v8  ;;  %v1172_v34 = vadd.s32 %v1170_v23, %v1168_v33  ;;  %v1188_v56 = vsel %vm1187_vm10, 1, %v1680_v61  ;;  %v18_v49 = vand.u32 2147483647, %v2251_v13 }
  0x8b   :  { %v1190_v18 = vadd.s32 %v1188_v56, %v1182_v31  ;;  %v1624_v22 = vadd.s32 4294967169, %v22_v21  ;;  %v1184_v54 = vshrl.u32 %v1180_v10, 16  ;;  %vm1191_vm11 = vc.u32 %v1189_v6, %v1185_v59 }
  0x8c   :  { %v605_v28 = vxor.u32 2147483648, %v604_v52  ;;  %v1173_v0 = vadd.s32 %v1172_v34, %v1162_v3  ;;  %v1140_v55 = vsel %vm1136_vm15, %v1120_v47, %v2202_v9  ;;  %v1142_v38 = vsel %vm1138_vm0, %v2204_v62, %v1141_v58  ;;  %v2323_v62 = vld [vmem:[%s2880_s1] sm:$0xff] }
  0x8d   :  { %v1192_v42 = vsel %vm1191_vm11, 1, %v1680_v61  ;;  %v28_v36 = vadd.s32 1, %v1624_v22  ;;  %v608_v21 = vsel %vm485_vm6, %v607_v35, %v2186_v17  ;;  %v1186_v20 = vshrl.u32 %v1181_v29, 16 }
  0x8e   :  { %v606_v2 = vsel %vm485_vm6, %v605_v28, %v604_v52  ;;  %v1194_v25 = vadd.s32 %v1192_v42, %v1190_v18  ;;  %v1174_v24 = vadd.s32 %v1173_v0, %v1164_v4  ;;  %v1193_v47 = vadd.s32 %v1189_v6, %v1185_v59 }
  0x8f   :  { %v2318_v9 = vsel %vm2289_vm7, %v2281_v15, %v606_v2  ;;  %vm29_vm12 = vcmp.gt.s32.totalorder %v28_v36, 0  ;;  %v1143_v17 = vsel %vm1137_vm3, %v1140_v55, %v1142_v38  ;;  %v610_v45 = vsel %vm2289_vm7, 0, %v608_v21 }
  0x90   :  { %v611_v10 = vmul.f32 %v2318_v9, %v2318_v9  ;;  %v1195_v35 = vadd.s32 %v1194_v25, %v1184_v54  ;;  %v25_v46 = vand.u32 8388607, %v18_v49  ;;  %v30_v11 = vsel %vm29_vm12, %v28_v36, 0 }
  0x91   :  { %v645_v16 = vand.u32 2139095040, %v2323_v62  ;;  %v1197_v29 = vmul.u32 %v2229_v14, %v1143_v17  ;;  %vm1199_vm13 = vc.u32 %v1174_v24, %v1193_v47  ;;  %v32_v50 = vand.u32 31, %v30_v11 }
  0x92   :  { %v612_v7 = vmul.f32 -0.001358992, %v611_v10  ;;  %v619_v57 = vmul.f32 -0.00019511016, %v611_v10  ;;  %v1196_v12 = vadd.s32 %v1195_v35, %v1186_v20  ;;  %v627_v37 = vadd.s32 3, %v610_v45 }
  0x93   :  { %v26_v60 = vor.u32 8388608, %v25_v46  ;;  %v33_v1 = vsub.s32 32, %v32_v50  ;;  %v642_v31 = vand.u32 2147483647, %v2323_v62  ;;  %v646_v33 = vshrl.u32 %v645_v16, 23 }
  0x94   :  { %v613_v63 = vadd.f32 0.041655596, %v612_v7  ;;  %v620_v27 = vadd.f32 0.008332121, %v619_v57  ;;  %v1200_v51 = vadd.s32 1, %v1196_v12  ;;  %v2336_v23 = vshrl.u32 %v30_v11, 5 }
  0x95   :  { %v35_v59 = vshll.u32 %v1674_v26, %v32_v50  ;;  %v38_v14 = vshll.u32 %v1675_v30, %v32_v50  ;;  %v36_v34 = vshrl.u32 %v1675_v30, %v33_v1  ;;  %v39_v56 = vshrl.u32 %v1676_v32, %v33_v1 }
  0x96   :  { %v614_v53 = vmul.f32 %v613_v63, %v611_v10  ;;  %v621_v8 = vmul.f32 %v620_v27, %v611_v10  ;;  %v1201_v3 = vsel %vm1199_vm13, %v1200_v51, %v1196_v12  ;;  %v41_v6 = vshll.u32 %v1676_v32, %v32_v50 }
  0x97   :  { %v1202_v58 = vadd.s32 %v1201_v3, %v1197_v29  ;;  %v42_v18 = vshrl.u32 %v1677_v19, %v33_v1  ;;  %v44_v22 = vshll.u32 %v1677_v19, %v32_v50  ;;  %v45_v28 = vshrl.u32 %v1678_v39, %v33_v1 }
  0x98   :  { %v622_v52 = vadd.f32 -0.16666654, %v621_v8  ;;  %v615_v0 = vadd.f32 -0.4999988, %v614_v53  ;;  %v2346_v54 = vand.u32 3, %v627_v37  ;;  %v2348_v55 = vshll.u32 %v26_v60, 8 }
  0x99   :  { %v1203_v4 = vadd.s32 536870912, %v1202_v58  ;;  %v2352_v38 = vand.u32 8388607, %v642_v31  ;;  %v47_v2 = vshll.u32 %v1678_v39, %v32_v50  ;;  %v48_v21 = vshrl.u32 %v1679_v48, %v33_v1 }
  0x9a   :  { %v623_v42 = vmul.f32 %v622_v52, %v611_v10  ;;  %v2356_v20 = vadd.s32 %v1193_v47, %v1174_v24  ;;  %v37_v25 = vor.u32 %v36_v34, %v35_v59  ;;  %v40_v17 = vor.u32 %v39_v56, %v38_v14 }
  0x9b   :  { %v1204_v36 = vshrl.u32 %v1203_v4, 30  ;;  %v1636_v35 = vadd.s32 4294967169, %v646_v33  ;;  %vm1106_vm14 = vcmp.lt.s32.totalorder %v2108_v40, 0  ;;  %v43_v46 = vor.u32 %v42_v18, %v41_v6 }
  0x9c   :  { %v46_v11 = vor.u32 %v45_v28, %v44_v22  ;;  %vm50_vm15 = vcmp.lt.s32.totalorder %v2336_v23, 1  ;;  %v616_v7 = vmul.f32 %v615_v0, %v611_v10  ;;  %v49_v57 = vor.u32 %v48_v21, %v47_v2 }
  0x9d   :  { %v1205_v45 = vshll.u32 %v1204_v36, 30  ;;  %vm53_vm0 = vcmp.lt.s32.totalorder %v2336_v23, 4  ;;  %v67_v12 = vand.u32 65535, %v2348_v55  ;;  %v624_v16 = vadd.f32 1.0, %v623_v42 }
  0x9e   :  { %vm52_vm1 = vcmp.lt.s32.totalorder %v2336_v23, 3  ;;  %v68_v24 = vshrl.u32 %v2348_v55, 16  ;;  %v34_v47 = vshrl.u32 %v1674_v26, %v33_v1  ;;  %vm51_vm2 = vcmp.lt.s32.totalorder %v2336_v23, 2 }
  0x9f   :  { %v2362_v29 = vsub.s32 %v1202_v58, %v1205_v45  ;;  %v58_v50 = vsel %vm50_vm15, %v37_v25, %v40_v17  ;;  %v652_v10 = vadd.s32 1, %v1636_v35  ;;  %v59_v27 = vsel %vm53_vm0, %v46_v11, 920167782 }
  0xa0   :  { %v62_v51 = vsel %vm50_vm15, %v40_v17, %v43_v46  ;;  %v2376_v37 = vadd.f32 1.0, %v616_v7  ;;  %v1228_v60 = vsub.s32 4, %v1204_v36  ;;  %v60_v1 = vsel %vm52_vm1, %v43_v46, %v59_v27 }
  0xa1   :  { %vm1207_vm3 = vcmp.lt.s32.totalorder %v2362_v29, 0  ;;  %v1208_v63 = vsub.s32 0, %v2362_v29  ;;  %v63_v53 = vsel %vm53_vm0, %v49_v57, 1326507024  ;;  %v2383_v8 = vmul.f32 %v624_v16, %v2318_v9 }
  0xa2   :  { %v61_v33 = vsel %vm51_vm2, %v58_v50, %v60_v1  ;;  %v64_v58 = vsel %vm52_vm1, %v46_v11, %v63_v53  ;;  %v55_v14 = vsel %vm53_vm0, %v43_v46, 2102212464  ;;  %v650_v4 = vor.u32 8388608, %v2352_v38 }
  0xa3   :  { %v1209_v3 = vsel %vm1207_vm3, %v1208_v63, %v2362_v29  ;;  %v65_v52 = vsel %vm51_vm2, %v62_v51, %v64_v58  ;;  %v91_v34 = vand.u32 65535, %v61_v33  ;;  %v92_v9 = vshrl.u32 %v61_v33, 16 }
  0xa4   :  { %v1210_v59 = vclz %v1209_v3  ;;  %v69_v56 = vand.u32 65535, %v65_v52  ;;  %v70_v6 = vshrl.u32 %v65_v52, 16  ;;  %v634_v18 = vxor.u32 2147483648, %v2376_v37 }
  0xa5   :  { %v2398_v28 = vsel %vm1106_vm14, %v1228_v60, %v1204_v36  ;;  %v54_v0 = vsel %vm50_vm15, %v34_v47, %v37_v25  ;;  %v56_v42 = vsel %vm52_vm1, %v40_v17, %v55_v14  ;;  %v631_v45 = vxor.u32 2147483648, %v2383_v8 }
  0xa6   :  { %v1646_v22 = vadd.s32 4294967294, %v1210_v59  ;;  %v71_v2 = vmul.u32 %v69_v56, %v67_v12  ;;  %v72_v21 = vmul.u32 %v70_v6, %v67_v12  ;;  %v73_v35 = vmul.u32 %v69_v56, %v68_v24 }
  0xa7   :  { %vm633_vm5 = vcmp.eq.s32.totalorder %v2346_v54, 2  ;;  %v95_v46 = vmul.u32 %v91_v34, %v68_v24  ;;  %vm653_vm7 = vcmp.gt.s32.totalorder %v652_v10, 0  ;;  %v74_v7 = vmul.u32 %v70_v6, %v68_v24 }
  0xa8   :  { %vm1647_vm6 = vcmp.lt.s32.totalorder %v1646_v22, 0  ;;  %v75_v36 = vshll.u32 %v72_v21, 16  ;;  %v94_v57 = vmul.u32 %v92_v9, %v67_v12  ;;  %vm2408_vm8 = vcmp.le.f32.partialorder %v1104_v41, 0.7853982 }
  0xa9   :  { %v1213_v11 = vsel %vm1647_vm6, 0, %v1646_v22  ;;  %v77_v50 = vshll.u32 %v73_v35, 16  ;;  %v2415_v63 = vsel %vm51_vm2, %v54_v0, %v56_v42  ;;  %v93_v27 = vmul.u32 %v91_v34, %v67_v12 }
  0xaa   :  { %v1214_v17 = vsub.s32 32, %v1213_v11  ;;  %v1215_v16 = vshll.u32 %v2362_v29, %v1213_v11  ;;  %v1218_v47 = vsub.s32 4294967266, %v1213_v11  ;;  %vm79_vm9 = vc.u32 %v71_v2, %v75_v36 }
  0xab   :  { %v654_v51 = vsel %vm653_vm7, %v652_v10, 0  ;;  %v80_v41 = vsel %vm79_vm9, 1, %v1680_v61  ;;  %v81_v53 = vadd.s32 %v75_v36, %v71_v2  ;;  %v76_v3 = vshrl.u32 %v72_v21, 16 }
  0xac   :  { %v1216_v60 = vshrl.u32 %v2356_v20, %v1214_v17  ;;  %v1219_v1 = vadd.s32 127, %v1218_v47  ;;  %v82_v33 = vadd.s32 %v80_v41, %v74_v7  ;;  %v96_v58 = vmul.u32 %v92_v9, %v68_v24 }
  0xad   :  { %v97_v59 = vshll.u32 %v94_v57, 16  ;;  %vm630_vm10 = vcmp.eq.s32.totalorder %v2346_v54, 0  ;;  %vm83_vm11 = vc.u32 %v81_v53, %v77_v50  ;;  %v99_v23 = vshll.u32 %v95_v46, 16 }
  0xae   :  { %v1217_v29 = vor.u32 %v1216_v60, %v1215_v16  ;;  %v1220_v14 = vshll.u32 %v1219_v1, 23  ;;  %v78_v52 = vshrl.u32 %v73_v35, 16  ;;  %v84_v12 = vsel %vm83_vm11, 1, %v1680_v61 }
  0xaf   :  { %vm101_vm12 = vc.u32 %v93_v27, %v97_v59  ;;  %v103_v10 = vadd.s32 %v97_v59, %v93_v27  ;;  %v86_v56 = vadd.s32 %v84_v12, %v82_v33  ;;  %v98_v22 = vshrl.u32 %v94_v57, 16 }
  0xb0   :  { %v1221_v20 = vor.u32 4788187, %v1220_v14  ;;  %v1224_v34 = vcvt.s32.f32 %v1217_v29  ;;  %v102_v6 = vsel %vm101_vm12, 1, %v1680_v61  ;;  %vm629_vm15 = vcmp.lt.s32.totalorder %v2346_v54, 2 }
  0xb1   :  { %v104_v0 = vadd.s32 %v102_v6, %v96_v58  ;;  %vm105_vm13 = vc.u32 %v103_v10, %v99_v23  ;;  %v2422_v24 = vadd.s32 %v103_v10, %v99_v23  ;;  %v87_v42 = vadd.s32 %v86_v56, %v76_v3 }
  0xb2   :  { %v1222_v9 = vand.u32 2147483647, %v1221_v20  ;;  %v106_v2 = vsel %vm105_vm13, 1, %v1680_v61  ;;  %v656_v21 = vand.u32 31, %v654_v51  ;;  %v635_v35 = vsel %vm633_vm5, %v634_v18, %v2383_v8 }
  0xb3   :  { %v1231_v11 = vsel %vm2408_vm8, 0, %v2398_v28  ;;  %v100_v7 = vshrl.u32 %v95_v46, 16  ;;  %v108_v36 = vadd.s32 %v106_v2, %v104_v0  ;;  %v2432_v17 = vadd.s32 %v87_v42, %v78_v52 }
  0xb4   :  { %v1225_v57 = vmul.f32 %v1224_v34, %v1222_v9  ;;  %v111_v16 = vmul.u32 %v2348_v55, %v2415_v63  ;;  %v2436_v47 = vsub.s32 32, %v656_v21  ;;  %v2438_v27 = vshrl.u32 %v654_v51, 5 }
  0xb5   :  { %v109_v50 = vadd.s32 %v108_v36, %v98_v22  ;;  %v659_v60 = vshll.u32 %v1674_v26, %v656_v21  ;;  %v662_v18 = vshll.u32 %v1675_v30, %v656_v21  ;;  %vm113_vm0 = vc.u32 %v2432_v17, %v2422_v24 }
  0xb6   :  { %v1226_v1 = vxor.u32 2147483648, %v1225_v57  ;;  %v665_v28 = vshll.u32 %v1676_v32, %v656_v21  ;;  %v668_v46 = vshll.u32 %v1677_v19, %v656_v21  ;;  %v660_v55 = vshrl.u32 %v1675_v30, %v2436_v47 }
  0xb7   :  { %v110_v41 = vadd.s32 %v109_v50, %v100_v7  ;;  %v663_v63 = vshrl.u32 %v1676_v32, %v2436_v47  ;;  %v666_v51 = vshrl.u32 %v1677_v19, %v2436_v47  ;;  %v669_v3 = vshrl.u32 %v1678_v39, %v2436_v47 }
  0xb8   :  { %v1227_v53 = vsel %vm1106_vm14, %v1226_v1, %v1225_v57  ;;  %v671_v33 = vshll.u32 %v1678_v39, %v656_v21  ;;  %v672_v58 = vshrl.u32 %v1679_v48, %v2436_v47  ;;  %v632_v59 = vsel %vm630_vm10, %v2376_v37, %v631_v45 }
  0xb9   :  { %v1230_v29 = vsel %vm2408_vm8, %v2108_v40, %v1227_v53  ;;  %v114_v14 = vadd.s32 1, %v110_v41  ;;  %vm674_vm14 = vcmp.lt.s32.totalorder %v2438_v27, 1  ;;  %v2468_v52 = vor.u32 %v660_v55, %v659_v60 }
  0xba   :  { %v1232_v23 = vmul.f32 %v1230_v29, %v1230_v29  ;;  %v2470_v12 = vor.u32 %v663_v63, %v662_v18  ;;  %v670_v10 = vor.u32 %v669_v3, %v668_v46  ;;  %v2475_v20 = vor.u32 %v666_v51, %v665_v28 }
  0xbb   :  { %v115_v8 = vsel %vm113_vm0, %v114_v14, %v110_v41  ;;  %v673_v37 = vor.u32 %v672_v58, %v671_v33  ;;  %vm677_vm1 = vcmp.lt.s32.totalorder %v2438_v27, 4  ;;  %vm676_vm2 = vcmp.lt.s32.totalorder %v2438_v27, 3 }
  0xbc   :  { %v1233_v45 = vmul.f32 -0.001358992, %v1232_v23  ;;  %v1240_v25 = vmul.f32 -0.00019511016, %v1232_v23  ;;  %v116_v34 = vadd.s32 %v115_v8, %v111_v16  ;;  %vm626_vm3 = vweird.f32 %v2281_v15 }
  0xbd   :  { %v636_v56 = vsel %vm629_vm15, %v632_v59, %v635_v35  ;;  %v2482_v6 = vand.u32 3, %v1231_v11  ;;  %v683_v22 = vsel %vm677_vm1, %v670_v10, 920167782  ;;  %vm675_vm5 = vcmp.lt.s32.totalorder %v2438_v27, 2 }
  0xbe   :  { %v1234_v0 = vadd.f32 0.041655596, %v1233_v45  ;;  %v1241_v9 = vadd.f32 0.008332121, %v1240_v25  ;;  %v117_v42 = vadd.s32 536870912, %v116_v34  ;;  %v682_v2 = vsel %vm674_vm14, %v2468_v52, %v2470_v12 }
  0xbf   :  { %v684_v54 = vsel %vm676_vm2, %v2475_v20, %v683_v22  ;;  %v687_v21 = vsel %vm677_vm1, %v673_v37, 1326507024  ;;  %v2498_v35 = vshll.u32 %v650_v4, 8  ;;  %v686_v57 = vsel %vm674_vm14, %v2470_v12, %v2475_v20 }
  0xc0   :  { %v1235_v11 = vmul.f32 %v1234_v0, %v1232_v23  ;;  %v1242_v7 = vmul.f32 %v1241_v9, %v1232_v23  ;;  %v2500_v36 = vshrl.u32 %v117_v42, 30  ;;  %v637_v16 = vsel %vm626_vm3, nan, %v636_v56 }
  0xc1   :  { %v688_v50 = vsel %vm676_vm2, %v670_v10, %v687_v21  ;;  %v685_v4 = vsel %vm675_vm5, %v682_v2, %v684_v54  ;;  %vm1247_vm6 = vweird.f32 %v2108_v40  ;;  %vm1249_vm7 = vcmp.lt.s32.totalorder %v2482_v6, 2 }
  0xc2   :  { %v1236_v60 = vadd.f32 -0.4999988, %v1235_v11  ;;  %v1243_v18 = vadd.f32 -0.16666654, %v1242_v7  ;;  %v119_v38 = vshll.u32 %v2500_v36, 30  ;;  %v689_v1 = vsel %vm675_vm5, %v686_v57, %v688_v50 }
  0xc3   :  { %v691_v15 = vand.u32 65535, %v2498_v35  ;;  %v692_v28 = vshrl.u32 %v2498_v35, 16  ;;  %vm1250_vm8 = vcmp.eq.s32.totalorder %v2482_v6, 0  ;;  %vm1253_vm9 = vcmp.eq.s32.totalorder %v2482_v6, 2 }
  0xc4   :  { %v1237_v46 = vmul.f32 %v1236_v60, %v1232_v23  ;;  %v1244_v41 = vmul.f32 %v1243_v18, %v1232_v23  ;;  %v120_v55 = vsub.s32 %v116_v34, %v119_v38  ;;  %v693_v63 = vand.u32 65535, %v689_v1 }
  0xc5   :  { %v694_v51 = vshrl.u32 %v689_v1, 16  ;;  %v716_v53 = vshrl.u32 %v685_v4, 16  ;;  %v658_v59 = vshrl.u32 %v1674_v26, %v2436_v47  ;;  %v715_v25 = vand.u32 65535, %v685_v4 }
  0xc6   :  { %v1238_v3 = vadd.f32 1.0, %v1237_v46  ;;  %v1245_v33 = vadd.f32 1.0, %v1244_v41  ;;  %vm121_vm10 = vcmp.lt.s32.totalorder %v120_v55, 0  ;;  %v122_v58 = vsub.s32 0, %v120_v55 }
  0xc7   :  { %v695_v14 = vmul.u32 %v693_v63, %v691_v15  ;;  %v696_v10 = vmul.u32 %v694_v51, %v691_v15  ;;  %v2523_v8 = vmul.u32 %v693_v63, %v692_v28  ;;  %v112_v34 = vadd.s32 %v2422_v24, %v2432_v17 }
  0xc8   :  { %v1246_v23 = vmul.f32 %v1245_v33, %v1230_v29  ;;  %v1254_v37 = vxor.u32 2147483648, %v1238_v3  ;;  %v123_v45 = vsel %vm121_vm10, %v122_v58, %v120_v55  ;;  %v698_v22 = vmul.u32 %v694_v51, %v692_v28 }
  0xc9   :  { %v124_v56 = vclz %v123_v45  ;;  %v699_v0 = vshll.u32 %v696_v10, 16  ;;  %v701_v47 = vshll.u32 %v2523_v8, 16  ;;  %v718_v2 = vmul.u32 %v716_v53, %v691_v15  ;;  %v2556_v45 = vld [vmem:[%s2879_s0 + $0x8] sm:$0xff] }
  0xca   :  { %v1251_v9 = vxor.u32 2147483648, %v1246_v23  ;;  %v1255_v42 = vsel %vm1253_vm9, %v1254_v37, %v1246_v23  ;;  %v678_v29 = vsel %vm674_vm14, %v658_v59, %v2468_v52  ;;  %v717_v11 = vmul.u32 %v715_v25, %v691_v15 }
  0xcb   :  { %v1625_v54 = vadd.s32 4294967294, %v124_v56  ;;  %vm703_vm11 = vc.u32 %v695_v14, %v699_v0  ;;  %v705_v21 = vadd.s32 %v699_v0, %v695_v14  ;;  %v719_v7 = vmul.u32 %v715_v25, %v692_v28 }
  0xcc   :  { %v1252_v24 = vsel %vm1250_vm8, %v1238_v3, %v1251_v9  ;;  %v704_v17 = vsel %vm703_vm11, 1, %v1680_v61  ;;  %v700_v50 = vshrl.u32 %v696_v10, 16  ;;  %v721_v52 = vshll.u32 %v718_v2, 16 }
  0xcd   :  { %v1256_v57 = vsel %vm1249_vm7, %v1252_v24, %v1255_v42  ;;  %vm1626_vm12 = vcmp.lt.s32.totalorder %v1625_v54, 0  ;;  %v706_v60 = vadd.s32 %v704_v17, %v698_v22  ;;  %vm707_vm13 = vc.u32 %v705_v21, %v701_v47 }
  0xce   :  { %v1257_v18 = vsel %vm1247_vm6, nan, %v1256_v57  ;;  %v127_v38 = vsel %vm1626_vm12, 0, %v1625_v54  ;;  %v679_v15 = vsel %vm677_vm1, %v2475_v20, 2102212464  ;;  %v708_v6 = vsel %vm707_vm13, 1, %v1680_v61 }
  0xcf   :  { %v1261_v4 = vadd.f32 %v1257_v18, %v637_v16  ;;  %v128_v1 = vsub.s32 32, %v127_v38  ;;  %v129_v46 = vshll.u32 %v120_v55, %v127_v38  ;;  %v132_v41 = vsub.s32 4294967266, %v127_v38 }
  0xd0   :  { %v720_v63 = vmul.u32 %v716_v53, %v692_v28  ;;  %v723_v51 = vshll.u32 %v719_v7, 16  ;;  %v710_v58 = vadd.s32 %v708_v6, %v706_v60  ;;  %v702_v16 = vshrl.u32 %v2523_v8, 16 }
  0xd1   :  { %v1283_v3 = vsel %vm1272_vm4, %v1261_v4, 0  ;;  %v130_v33 = vshrl.u32 %v112_v34, %v128_v1  ;;  %v133_v40 = vadd.s32 127, %v132_v41  ;;  %vm725_vm15 = vc.u32 %v717_v11, %v721_v52 }
  0xd2   :  { %v2545_v59 = vand.u32 4294901760, %v1283_v3  ;;  %v727_v55 = vadd.s32 %v721_v52, %v717_v11  ;;  %v711_v23 = vadd.s32 %v710_v58, %v700_v50  ;;  %v726_v20 = vsel %vm725_vm15, 1, %v1680_v61 }
  0xd3   :  { %v131_v14 = vor.u32 %v130_v33, %v129_v46  ;;  %v134_v10 = vshll.u32 %v133_v40, 23  ;;  %v722_v28 = vshrl.u32 %v718_v2, 16  ;;  %v728_v53 = vadd.s32 %v726_v20, %v720_v63 }
  0xd4   :  { %v2550_v37 = vsub.f32 %v1283_v3, %v2545_v59  ;;  %vm729_vm0 = vc.u32 %v727_v55, %v723_v51  ;;  %1411 = vmatmul.f32.gmra.mxu3 %v2545_v59  ;;  %v680_v34 = vsel %vm676_vm2, %v2470_v12, %v679_v15  ;;  %v724_v0 = vshrl.u32 %v719_v7, 16 }
  0xd5   :  { %v135_v8 = vor.u32 4788187, %v134_v10  ;;  %v138_v25 = vcvt.s32.f32 %v131_v14  ;;  %v730_v56 = vsel %vm729_vm0, 1, %v1680_v61  ;;  %v712_v47 = vadd.s32 %v711_v23, %v702_v16 }
  0xd6   :  { %v1335_v22 = vand.u32 4294901760, %v2550_v37  ;;  %v732_v9 = vadd.s32 %v730_v56, %v728_v53  ;;  %v731_v2 = vadd.s32 %v727_v55, %v723_v51  ;;  %v176_v54 = vand.u32 2139095040, %v2556_v45 }
  0xd7   :  { %v136_v42 = vand.u32 2147483647, %v135_v8  ;;  %v681_v24 = vsel %vm675_vm5, %v678_v29, %v680_v34  ;;  %v142_v11 = vsub.s32 4, %v2500_v36  ;;  %vm2572_vm14 = vcmp.le.f32.partialorder %v18_v49, 0.7853982  ;;  %v2583_v49 = vld [vmem:[%s2880_s1 + $0x8] sm:$0xff] }
  0xd8   :  { %v1336_v21 = vsub.f32 %v2550_v37, %v1335_v22  ;;  %v733_v17 = vadd.s32 %v732_v9, %v722_v28  ;;  %v177_v57 = vshrl.u32 %v176_v54, 23  ;;  %vm20_vm1 = vcmp.lt.s32.totalorder %v2251_v13, 0 }
  0xd9   :  { %v139_v12 = vmul.f32 %v138_v25, %v136_v42  ;;  %v735_v38 = vmul.u32 %v2498_v35, %v681_v24  ;;  %vm737_vm2 = vc.u32 %v712_v47, %v731_v2  ;;  %v173_v52 = vand.u32 2147483647, %v2556_v45 }
  0xda   :  { %v1337_v50 = vand.u32 4294901760, %v1336_v21  ;;  %v734_v60 = vadd.s32 %v733_v17, %v724_v0  ;;  %v1627_v27 = vadd.s32 4294967169, %v177_v57  ;;  %v143_v1 = vsel %vm20_vm1, %v142_v11, %v2500_v36 }
  0xdb   :  { %v140_v18 = vxor.u32 2147483648, %v139_v12  ;;  %v145_v36 = vsel %vm2572_vm14, 0, %v143_v1  ;;  %v180_v63 = vand.u32 8388607, %v173_v52  ;;  %v799_v3 = vand.u32 2139095040, %v2583_v49 }
  0xdc   :  { %1338 = vmatmul.f32.gmra.mxu2 %v1337_v50  ;;  %v738_v29 = vadd.s32 1, %v734_v60  ;;  %v183_v46 = vadd.s32 1, %v1627_v27  ;;  %v796_v16 = vand.u32 2147483647, %v2583_v49  ;;  %v162_v10 = vadd.s32 3, %v145_v36 }
  0xdd   :  { %v141_v4 = vsel %vm20_vm1, %v140_v18, %v139_v12  ;;  %v181_v20 = vor.u32 8388608, %v180_v63  ;;  %v800_v8 = vshrl.u32 %v799_v3, 23  ;;  %vm644_vm5 = vcmp.lt.s32.totalorder %v2323_v62, 0 }
  0xde   :  { %v2588_v41 = vsel %vm2572_vm14, %v2251_v13, %v141_v4  ;;  %v739_v35 = vsel %vm737_vm2, %v738_v29, %v734_v60  ;;  %vm184_vm3 = vcmp.gt.s32.totalorder %v183_v46, 0  ;;  %v2607_v57 = vand.u32 3, %v162_v10 }
  0xdf   :  { %v146_v15 = vmul.f32 %v2588_v41, %v2588_v41  ;;  %v740_v6 = vadd.s32 %v739_v35, %v735_v38  ;;  %v185_v51 = vsel %vm184_vm3, %v183_v46, 0  ;;  %v736_v50 = vadd.s32 %v731_v2, %v712_v47 }
  0xe0   :  { %v187_v13 = vand.u32 31, %v185_v51  ;;  %v2598_v28 = vshrl.u32 %v185_v51, 5  ;;  %v2609_v7 = vshll.u32 %v181_v20, 8  ;;  %v2613_v60 = vand.u32 8388607, %v796_v16 }
  0xe1   :  { %v147_v33 = vmul.f32 -0.001358992, %v146_v15  ;;  %v154_v40 = vmul.f32 -0.00019511016, %v146_v15  ;;  %v741_v58 = vadd.s32 536870912, %v740_v6  ;;  %v1639_v27 = vadd.s32 4294967169, %v800_v8 }
  0xe2   :  { %v188_v53 = vsub.s32 32, %v187_v13  ;;  %v190_v0 = vshll.u32 %v1674_v26, %v187_v13  ;;  %v193_v42 = vshll.u32 %v1675_v30, %v187_v13  ;;  %v196_v21 = vshll.u32 %v1676_v32, %v187_v13 }
  0xe3   :  { %v148_v55 = vadd.f32 0.041655596, %v147_v33  ;;  %v155_v14 = vadd.f32 0.008332121, %v154_v40  ;;  %v742_v23 = vshrl.u32 %v741_v58, 30  ;;  %v199_v1 = vshll.u32 %v1677_v19, %v187_v13 }
  0xe4   :  { %v191_v9 = vshrl.u32 %v1675_v30, %v188_v53  ;;  %v194_v54 = vshrl.u32 %v1676_v32, %v188_v53  ;;  %v197_v11 = vshrl.u32 %v1677_v19, %v188_v53  ;;  %vm2617_vm7 = vcmp.le.f32.partialorder %v642_v31, 0.7853982 }
  0xe5   :  { %v149_v25 = vmul.f32 %v148_v55, %v146_v15  ;;  %v156_v34 = vmul.f32 %v155_v14, %v146_v15  ;;  %v743_v56 = vshll.u32 %v742_v23, 30  ;;  %v200_v47 = vshrl.u32 %v1678_v39, %v188_v53 }
  0xe6   :  { %v192_v4 = vor.u32 %v191_v9, %v190_v0  ;;  %vm205_vm8 = vcmp.lt.s32.totalorder %v2598_v28, 1  ;;  %v195_v35 = vor.u32 %v194_v54, %v193_v42  ;;  %v766_v63 = vsub.s32 4, %v742_v23 }
  0xe7   :  { %v150_v24 = vadd.f32 -0.4999988, %v149_v25  ;;  %v157_v17 = vadd.f32 -0.16666654, %v156_v34  ;;  %v744_v12 = vsub.s32 %v740_v6, %v743_v56  ;;  %v198_v6 = vor.u32 %v197_v11, %v196_v21 }
  0xe8   :  { %v201_v51 = vor.u32 %v200_v47, %v199_v1  ;;  %vm207_vm9 = vcmp.lt.s32.totalorder %v2598_v28, 3  ;;  %v202_v3 = vshll.u32 %v1678_v39, %v187_v13  ;;  %v203_v33 = vshrl.u32 %v1679_v48, %v188_v53 }
  0xe9   :  { %v158_v18 = vmul.f32 %v157_v17, %v146_v15  ;;  %vm745_vm6 = vcmp.lt.s32.totalorder %v744_v12, 0  ;;  %v746_v38 = vsub.s32 0, %v744_v12  ;;  %v151_v2 = vmul.f32 %v150_v24, %v146_v15 }
  0xea   :  { %vm208_vm10 = vcmp.lt.s32.totalorder %v2598_v28, 4  ;;  %vm168_vm11 = vcmp.eq.s32.totalorder %v2607_v57, 2  ;;  %v804_v58 = vor.u32 8388608, %v2613_v60  ;;  %v806_v55 = vadd.s32 1, %v1639_v27 }
  0xeb   :  { %v747_v46 = vsel %vm745_vm6, %v746_v38, %v744_v12  ;;  %v159_v31 = vadd.f32 1.0, %v158_v18  ;;  %v214_v15 = vsel %vm208_vm10, %v201_v51, 920167782  ;;  %v2632_v14 = vadd.f32 1.0, %v151_v2 }
  0xec   :  { %v748_v36 = vclz %v747_v46  ;;  %vm206_vm12 = vcmp.lt.s32.totalorder %v2598_v28, 2  ;;  %v213_v13 = vsel %vm205_vm8, %v192_v4, %v195_v35  ;;  %v215_v10 = vsel %vm207_vm9, %v198_v6, %v214_v15 }
  0xed   :  { %v2641_v20 = vsel %vm644_vm5, %v766_v63, %v742_v23  ;;  %v189_v8 = vshrl.u32 %v1674_v26, %v188_v53  ;;  %v222_v25 = vand.u32 65535, %v2609_v7  ;;  %v2646_v34 = vmul.f32 %v159_v31, %v2588_v41 }
  0xee   :  { %v1637_v40 = vadd.s32 4294967294, %v748_v36  ;;  %v204_v0 = vor.u32 %v203_v33, %v202_v3  ;;  %v223_v9 = vshrl.u32 %v2609_v7, 16  ;;  %v216_v24 = vsel %vm206_vm12, %v213_v13, %v215_v10 }
  0xef   :  { %v169_v23 = vxor.u32 2147483648, %v2632_v14  ;;  %v769_v53 = vsel %vm2617_vm7, 0, %v2641_v20  ;;  %v210_v41 = vsel %vm208_vm10, %v198_v6, 2102212464  ;;  %vm807_vm15 = vcmp.gt.s32.totalorder %v806_v55, 0 }
  0xf0   :  { %vm1638_vm13 = vcmp.lt.s32.totalorder %v1637_v40, 0  ;;  %v209_v18 = vsel %vm205_vm8, %v189_v8, %v192_v4  ;;  %v166_v38 = vxor.u32 2147483648, %v2646_v34  ;;  %v218_v27 = vsel %vm208_vm10, %v204_v0, 1326507024 }
  0xf1   :  { %v751_v56 = vsel %vm1638_vm13, 0, %v1637_v40  ;;  %v246_v1 = vand.u32 65535, %v216_v24  ;;  %v247_v47 = vshrl.u32 %v216_v24, 16  ;;  %v211_v36 = vsel %vm207_vm9, %v195_v35, %v210_v41 }
  0xf2   :  { %v752_v42 = vsub.s32 32, %v751_v56  ;;  %v753_v54 = vshll.u32 %v744_v12, %v751_v56  ;;  %v756_v21 = vsub.s32 4294967266, %v751_v56  ;;  %v217_v12 = vsel %vm205_vm8, %v195_v35, %v198_v6 }
  0xf3   :  { %v248_v63 = vmul.u32 %v246_v1, %v222_v25  ;;  %v249_v6 = vmul.u32 %v247_v47, %v222_v25  ;;  %v250_v31 = vmul.u32 %v246_v1, %v223_v9  ;;  %v2673_v13 = vsel %vm168_vm11, %v169_v23, %v2646_v34 }
  0xf4   :  { %v754_v17 = vshrl.u32 %v736_v50, %v752_v42  ;;  %v757_v11 = vadd.s32 127, %v756_v21  ;;  %v219_v50 = vsel %vm207_vm9, %v201_v51, %v218_v27  ;;  %v251_v10 = vmul.u32 %v247_v47, %v223_v9 }
  0xf5   :  { %v220_v4 = vsel %vm206_vm12, %v217_v12, %v219_v50  ;;  %v252_v35 = vshll.u32 %v249_v6, 16  ;;  %v254_v8 = vshll.u32 %v250_v31, 16  ;;  %v808_v24 = vsel %vm807_vm15, %v806_v55, 0 }
  0xf6   :  { %v755_v2 = vor.u32 %v754_v17, %v753_v54  ;;  %v758_v46 = vshll.u32 %v757_v11, 23  ;;  %v224_v40 = vand.u32 65535, %v220_v4  ;;  %v225_v15 = vshrl.u32 %v220_v4, 16 }
  0xf7   :  { %v2677_v54 = vsel %vm206_vm12, %v209_v18, %v211_v36  ;;  %vm256_vm0 = vc.u32 %v248_v63, %v252_v35  ;;  %v258_v21 = vadd.s32 %v252_v35, %v248_v63  ;;  %v253_v12 = vshrl.u32 %v249_v6, 16 }
  0xf8   :  { %v759_v3 = vor.u32 4788187, %v758_v46  ;;  %v762_v33 = vcvt.s32.f32 %v755_v2  ;;  %v226_v51 = vmul.u32 %v224_v40, %v222_v25  ;;  %v227_v0 = vmul.u32 %v225_v15, %v222_v25 }
  0xf9   :  { %v228_v42 = vmul.u32 %v224_v40, %v223_v9  ;;  %v229_v17 = vmul.u32 %v225_v15, %v223_v9  ;;  %v255_v27 = vshrl.u32 %v250_v31, 16  ;;  %v257_v1 = vsel %vm256_vm0, 1, %v1680_v61 }
  0xfa   :  { %v760_v56 = vand.u32 2147483647, %v759_v3  ;;  %v230_v11 = vshll.u32 %v227_v0, 16  ;;  %vm260_vm14 = vc.u32 %v258_v21, %v254_v8  ;;  %vm165_vm1 = vcmp.eq.s32.totalorder %v2607_v57, 0 }
  0xfb   :  { %v232_v23 = vshll.u32 %v228_v42, 16  ;;  %v259_v18 = vadd.s32 %v257_v1, %v251_v10  ;;  %v231_v47 = vshrl.u32 %v227_v0, 16  ;;  %v261_v55 = vsel %vm260_vm14, 1, %v1680_v61 }
  0xfc   :  { %v763_v41 = vmul.f32 %v762_v33, %v760_v56  ;;  %vm234_vm2 = vc.u32 %v226_v51, %v230_v11  ;;  %v236_v28 = vadd.s32 %v230_v11, %v226_v51  ;;  %v810_v46 = vand.u32 31, %v808_v24 }
  0xfd   :  { %v235_v2 = vsel %vm234_vm2, 1, %v1680_v61  ;;  %v263_v50 = vadd.s32 %v261_v55, %v259_v18  ;;  %v266_v6 = vmul.u32 %v2609_v7, %v2677_v54  ;;  %vm164_vm6 = vcmp.lt.s32.totalorder %v2607_v57, 2 }
  0xfe   :  { %v764_v25 = vxor.u32 2147483648, %v763_v41  ;;  %v237_v36 = vadd.s32 %v235_v2, %v229_v17  ;;  %vm238_vm3 = vc.u32 %v236_v28, %v232_v23  ;;  %v2694_v31 = vsub.s32 32, %v810_v46 }
  0xff   :  { %v239_v63 = vsel %vm238_vm3, 1, %v1680_v61  ;;  %v233_v33 = vshrl.u32 %v228_v42, 16  ;;  %v264_v15 = vadd.s32 %v263_v50, %v253_v12  ;;  %v2699_v10 = vadd.s32 %v258_v21, %v254_v8 }
 0x100   :  { %v765_v9 = vsel %vm644_vm5, %v764_v25, %v763_v41  ;;  %v241_v40 = vadd.s32 %v239_v63, %v237_v36  ;;  %v2701_v35 = vshrl.u32 %v808_v24, 5  ;;  %v813_v56 = vshll.u32 %v1674_v26, %v810_v46 }
 0x101   :  { %v2689_v4 = vsel %vm2617_vm7, %v2323_v62, %v765_v9  ;;  %v816_v51 = vshll.u32 %v1675_v30, %v810_v46  ;;  %v265_v41 = vadd.s32 %v264_v15, %v255_v27  ;;  %v814_v17 = vshrl.u32 %v1675_v30, %v2694_v31 }
 0x102   :  { %v770_v3 = vmul.f32 %v2689_v4, %v2689_v4  ;;  %v242_v54 = vadd.s32 %v241_v40, %v231_v47  ;;  %v817_v42 = vshrl.u32 %v1676_v32, %v2694_v31  ;;  %v819_v11 = vshll.u32 %v1676_v32, %v810_v46  ;;  %v1673_v32 = vld [vmem:[%s2879_s0] sm:$0xff] }
 0x103   :  { %v822_v8 = vshll.u32 %v1677_v19, %v810_v46  ;;  %v269_v12 = vadd.s32 1, %v265_v41  ;;  %v820_v1 = vshrl.u32 %v1677_v19, %v2694_v31  ;;  %v823_v27 = vshrl.u32 %v1678_v39, %v2694_v31 }
 0x104   :  { %v771_v0 = vmul.f32 -0.001358992, %v770_v3  ;;  %v778_v7 = vmul.f32 -0.00019511016, %v770_v3  ;;  %v2711_v23 = vadd.s32 %v242_v54, %v233_v33  ;;  %v825_v30 = vshll.u32 %v1678_v39, %v810_v46 }
 0x105   :  { %v826_v25 = vshrl.u32 %v1679_v48, %v2694_v31  ;;  %vm161_vm5 = vweird.f32 %v1673_v32  ;;  %v786_v19 = vand.u32 3, %v769_v53  ;;  %v167_v39 = vsel %vm165_vm1, %v2632_v14, %v166_v38 }
 0x106   :  { %v772_v21 = vadd.f32 0.041655596, %v771_v0  ;;  %v779_v24 = vadd.f32 0.008332121, %v778_v7  ;;  %vm268_vm8 = vc.u32 %v2711_v23, %v2699_v10  ;;  %v2734_v47 = vor.u32 %v814_v17, %v813_v56 }
 0x107   :  { %v270_v48 = vsel %vm268_vm8, %v269_v12, %v265_v41  ;;  %v824_v2 = vor.u32 %v823_v27, %v822_v8  ;;  %v2736_v29 = vor.u32 %v817_v42, %v816_v51  ;;  %v2738_v20 = vor.u32 %v820_v1, %v819_v11 }
 0x108   :  { %v773_v28 = vmul.f32 %v772_v21, %v770_v3  ;;  %v780_v18 = vmul.f32 %v779_v24, %v770_v3  ;;  %v271_v9 = vadd.s32 %v270_v48, %v266_v6  ;;  %v827_v53 = vor.u32 %v826_v25, %v825_v30 }
 0x109   :  { %vm828_vm7 = vcmp.lt.s32.totalorder %v2701_v35, 1  ;;  %vm831_vm9 = vcmp.lt.s32.totalorder %v2701_v35, 4  ;;  %vm830_vm10 = vcmp.lt.s32.totalorder %v2701_v35, 3  ;;  %v171_v14 = vsel %vm164_vm6, %v167_v39, %v2673_v13 }
 0x10a   :  { %v774_v55 = vadd.f32 -0.4999988, %v773_v28  ;;  %v781_v46 = vadd.f32 -0.16666654, %v780_v18  ;;  %v272_v50 = vadd.s32 536870912, %v271_v9  ;;  %vm785_vm11 = vweird.f32 %v2323_v62 }
 0x10b   :  { %vm829_vm12 = vcmp.lt.s32.totalorder %v2701_v35, 2  ;;  %v837_v38 = vsel %vm831_vm9, %v824_v2, 920167782  ;;  %vm791_vm13 = vcmp.eq.s32.totalorder %v786_v19, 2  ;;  %v841_v13 = vsel %vm831_vm9, %v827_v53, 1326507024 }
 0x10c   :  { %v775_v34 = vmul.f32 %v774_v55, %v770_v3  ;;  %v782_v36 = vmul.f32 %v781_v46, %v770_v3  ;;  %v2750_v33 = vshrl.u32 %v272_v50, 30  ;;  %v836_v3 = vsel %vm828_vm7, %v2734_v47, %v2736_v29 }
 0x10d   :  { %v838_v57 = vsel %vm830_vm10, %v2738_v20, %v837_v38  ;;  %v2763_v40 = vshll.u32 %v804_v58, 8  ;;  %v840_v0 = vsel %vm828_vm7, %v2736_v29, %v2738_v20  ;;  %vm787_vm15 = vcmp.lt.s32.totalorder %v786_v19, 2 }
 0x10e   :  { %v776_v63 = vadd.f32 1.0, %v775_v34  ;;  %v783_v6 = vadd.f32 1.0, %v782_v36  ;;  %v274_v51 = vshll.u32 %v2750_v33, 30  ;;  %vm788_vm0 = vcmp.eq.s32.totalorder %v786_v19, 0 }
 0x10f   :  { %v839_v7 = vsel %vm829_vm12, %v836_v3, %v838_v57  ;;  %v842_v60 = vsel %vm830_vm10, %v824_v2, %v841_v13  ;;  %v172_v17 = vsel %vm161_vm5, nan, %v171_v14  ;;  %v845_v11 = vand.u32 65535, %v2763_v40 }
 0x110   :  { %v784_v15 = vmul.f32 %v783_v6, %v2689_v4  ;;  %v792_v56 = vxor.u32 2147483648, %v776_v63  ;;  %v2775_v41 = vsub.s32 %v271_v9, %v274_v51  ;;  %v846_v4 = vshrl.u32 %v2763_v40, 16 }
 0x111   :  { %v843_v42 = vsel %vm829_vm12, %v840_v0, %v842_v60  ;;  %v870_v8 = vshrl.u32 %v839_v7, 16  ;;  %v869_v28 = vand.u32 65535, %v839_v7  ;;  %v267_v62 = vadd.s32 %v2699_v10, %v2711_v23 }
 0x112   :  { %v789_v58 = vxor.u32 2147483648, %v784_v15  ;;  %v793_v54 = vsel %vm791_vm13, %v792_v56, %v784_v15  ;;  %vm276_vm14 = vcmp.lt.s32.totalorder %v2775_v41, 0  ;;  %v277_v24 = vsub.s32 0, %v2775_v41 }
 0x113   :  { %v847_v12 = vand.u32 65535, %v843_v42  ;;  %v848_v27 = vshrl.u32 %v843_v42, 16  ;;  %v872_v55 = vmul.u32 %v870_v8, %v845_v11  ;;  %v871_v50 = vmul.u32 %v869_v28, %v845_v11 }
 0x114   :  { %v790_v21 = vsel %vm788_vm0, %v776_v63, %v789_v58  ;;  %v278_v25 = vsel %vm276_vm14, %v277_v24, %v2775_v41  ;;  %v873_v38 = vmul.u32 %v869_v28, %v846_v4  ;;  %v874_v23 = vmul.u32 %v870_v8, %v846_v4 }
 0x115   :  { %v794_v1 = vsel %vm787_vm15, %v790_v21, %v793_v54  ;;  %v851_v32 = vmul.u32 %v847_v12, %v846_v4  ;;  %v279_v39 = vclz %v278_v25  ;;  %v849_v48 = vmul.u32 %v847_v12, %v845_v11 }
 0x116   :  { %v795_v30 = vsel %vm785_vm11, nan, %v794_v1  ;;  %v850_v2 = vmul.u32 %v848_v27, %v845_v11  ;;  %v852_v53 = vmul.u32 %v848_v27, %v846_v4  ;;  %v875_v57 = vshll.u32 %v872_v55, 16 }
 0x117   :  { %v1258_v18 = vadd.f32 %v795_v30, %v172_v17  ;;  %v1628_v9 = vadd.s32 4294967294, %v279_v39  ;;  %v855_v36 = vshll.u32 %v851_v32, 16  ;;  %v877_v17 = vshll.u32 %v873_v38, 16 }
 0x118   :  { %v853_v34 = vshll.u32 %v850_v2, 16  ;;  %v854_v10 = vshrl.u32 %v850_v2, 16  ;;  %vm879_vm6 = vc.u32 %v871_v50, %v875_v57  ;;  %v812_v11 = vshrl.u32 %v1674_v26, %v2694_v31 }
 0x119   :  { %v1274_v46 = vsel %vm1272_vm4, %v1258_v18, 0  ;;  %vm1629_vm1 = vcmp.lt.s32.totalorder %v1628_v9, 0  ;;  %v880_v24 = vsel %vm879_vm6, 1, %v1680_v61  ;;  %v881_v4 = vadd.s32 %v875_v57, %v871_v50 }
 0x11a   :  { %v2789_v19 = vand.u32 4294901760, %v1274_v46  ;;  %vm857_vm2 = vc.u32 %v849_v48, %v853_v34  ;;  %v859_v14 = vadd.s32 %v853_v34, %v849_v48  ;;  %v282_v6 = vsel %vm1629_vm1, 0, %v1628_v9 }
 0x11b   :  { %v858_v3 = vsel %vm857_vm2, 1, %v1680_v61  ;;  %v283_v13 = vsub.s32 32, %v282_v6  ;;  %v287_v15 = vsub.s32 4294967266, %v282_v6  ;;  %v284_v0 = vshll.u32 %v2775_v41, %v282_v6 }
 0x11c   :  { %v1310_v63 = vsub.f32 %v1274_v46, %v2789_v19  ;;  %1399 = vmatmul.f32.vlgmr.msra.gmra.mxu1 %v2789_v19  ;;  %v860_v56 = vadd.s32 %v858_v3, %v852_v53  ;;  %vm861_vm3 = vc.u32 %v859_v14, %v855_v36  ;;  %v833_v41 = vsel %vm831_vm9, %v2738_v20, 2102212464 }
 0x11d   :  { %v285_v7 = vshrl.u32 %v267_v62, %v283_v13  ;;  %v288_v60 = vadd.s32 127, %v287_v15  ;;  %v862_v54 = vsel %vm861_vm3, 1, %v1680_v61  ;;  %v882_v8 = vadd.s32 %v880_v24, %v874_v23 }
 0x11e   :  { %v1311_v51 = vand.u32 4294901760, %v1310_v63  ;;  %1449 = vmatmul.f32.vlgmr.msrb.gmra.mxu2 %v1310_v63  ;;  %v864_v21 = vadd.s32 %v862_v54, %v860_v56  ;;  %v856_v1 = vshrl.u32 %v851_v32, 16  ;;  %v876_v28 = vshrl.u32 %v872_v55, 16 }
 0x11f   :  { %v289_v42 = vshll.u32 %v288_v60, 23  ;;  %v286_v30 = vor.u32 %v285_v7, %v284_v0  ;;  %vm883_vm5 = vc.u32 %v881_v4, %v877_v17  ;;  %v832_v26 = vsel %vm828_vm7, %v812_v11, %v2734_v47 }
 0x120   :  { %v1312_v58 = vsub.f32 %v1310_v63, %v1311_v51  ;;  %1495 = vmatmul.f32.vlgmr.msrb.gmra.mxu3 %v1311_v51  ;;  %v865_v27 = vadd.s32 %v864_v21, %v854_v10  ;;  %v834_v31 = vsel %vm830_vm10, %v2736_v29, %v833_v41  ;;  %v884_v18 = vsel %vm883_vm5, 1, %v1680_v61 }
 0x121   :  { %v290_v25 = vor.u32 4788187, %v289_v42  ;;  %v878_v20 = vshrl.u32 %v873_v38, 16  ;;  %v886_v39 = vadd.s32 %v884_v18, %v882_v8  ;;  %v885_v32 = vadd.s32 %v881_v4, %v877_v17 }
 0x122   :  { %v1313_v12 = vand.u32 4294901760, %v1312_v58  ;;  %v866_v48 = vadd.s32 %v865_v27, %v856_v1  ;;  %v293_v46 = vcvt.s32.f32 %v286_v30  ;;  %v835_v55 = vsel %vm829_vm12, %v832_v26, %v834_v31 }
 0x123   :  { %v291_v2 = vand.u32 2147483647, %v290_v25  ;;  %v887_v9 = vadd.s32 %v886_v39, %v876_v28  ;;  %v889_v34 = vmul.u32 %v2763_v40, %v835_v55  ;;  %vm175_vm7 = vcmp.lt.s32.totalorder %v2556_v45, 0 }
 0x124   :  { %1314 = vmatmul.f32.vlgmr.msra.gmra.mxu0 %v1313_v12  ;;  %vm891_vm8 = vc.u32 %v866_v48, %v885_v32  ;;  %vm2817_vm9 = vcmp.le.f32.partialorder %v173_v52, 0.7853982  ;;  %v890_v52 = vadd.s32 %v885_v32, %v866_v48  ;;  %v297_v4 = vsub.s32 4, %v2750_v33 }
 0x125   :  { %v888_v53 = vadd.s32 %v887_v9, %v878_v20  ;;  %v294_v47 = vmul.f32 %v293_v46, %v291_v2  ;;  %vm798_vm12 = vcmp.lt.s32.totalorder %v2583_v49, 0  ;;  %vm2833_vm13 = vcmp.le.f32.partialorder %v796_v16, 0.7853982 }
 0x126   :  { %v298_v25 = vsel %vm175_vm7, %v297_v4, %v2750_v33  ;;  %vm316_vm2 = vweird.f32 %v2556_v45  ;;  %vm939_vm5 = vweird.f32 %v2583_v49 }
 0x127   :  { %v892_v62 = vadd.s32 1, %v888_v53  ;;  %v295_v50 = vxor.u32 2147483648, %v294_v47  ;;  %v300_v20 = vsel %vm2817_vm9, 0, %v298_v25 }
 0x128   :  { %v317_v55 = vadd.s32 3, %v300_v20 }
 0x129   :  { %v893_v36 = vsel %vm891_vm8, %v892_v62, %v888_v53  ;;  %v296_v35 = vsel %vm175_vm7, %v295_v50, %v294_v47 }
 0x12a   :  { %v894_v29 = vadd.s32 %v893_v36, %v889_v34  ;;  %v299_v63 = vsel %vm2817_vm9, %v2556_v45, %v296_v35 }
 0x12b   :  { %v301_v57 = vmul.f32 %v299_v63, %v299_v63 }
 0x12c   :  { %v895_v61 = vadd.s32 536870912, %v894_v29 }
 0x12d   :  { %v309_v56 = vmul.f32 -0.00019511016, %v301_v57  ;;  %v302_v10 = vmul.f32 -0.001358992, %v301_v57 }
 0x12e   :  { %v896_v14 = vshrl.u32 %v895_v61, 30 }
 0x12f   :  { %v310_v0 = vadd.f32 0.008332121, %v309_v56  ;;  %v303_v42 = vadd.f32 0.041655596, %v302_v10 }
 0x130   :  { %v897_v40 = vshll.u32 %v896_v14, 30  ;;  %v920_v48 = vsub.s32 4, %v896_v14 }
 0x131   :  { %v311_v11 = vmul.f32 %v310_v0, %v301_v57  ;;  %v304_v8 = vmul.f32 %v303_v42, %v301_v57 }
 0x132   :  { %v898_v6 = vsub.s32 %v894_v29, %v897_v40  ;;  %v921_v16 = vsel %vm798_vm12, %v920_v48, %v896_v14  ;;  %v318_v29 = vand.u32 3, %v317_v55 }
 0x133   :  { %v312_v1 = vadd.f32 -0.16666654, %v311_v11  ;;  %v305_v28 = vadd.f32 -0.4999988, %v304_v8  ;;  %v923_v50 = vsel %vm2833_vm13, 0, %v921_v16 }
 0x134   :  { %vm899_vm10 = vcmp.lt.s32.totalorder %v898_v6, 0  ;;  %v900_v3 = vsub.s32 0, %v898_v6  ;;  %vm320_vm15 = vcmp.eq.s32.totalorder %v318_v29, 0  ;;  %vm323_vm0 = vcmp.eq.s32.totalorder %v318_v29, 2 }
 0x135   :  { %v313_v26 = vmul.f32 %v312_v1, %v301_v57  ;;  %v306_v32 = vmul.f32 %v305_v28, %v301_v57  ;;  %v940_v57 = vand.u32 3, %v923_v50  ;;  %vm319_vm14 = vcmp.lt.s32.totalorder %v318_v29, 2 }
 0x136   :  { %v901_v13 = vsel %vm899_vm10, %v900_v3, %v898_v6 }
 0x137   :  { %v902_v15 = vclz %v901_v13  ;;  %v314_v2 = vadd.f32 1.0, %v313_v26  ;;  %v307_v34 = vadd.f32 1.0, %v306_v32  ;;  %vm945_vm1 = vcmp.eq.s32.totalorder %v940_v57, 2 }
 0x138   :  { %vm942_vm3 = vcmp.eq.s32.totalorder %v940_v57, 0  ;;  %vm941_vm6 = vcmp.lt.s32.totalorder %v940_v57, 2 }
 0x139   :  { %v1640_v51 = vadd.s32 4294967294, %v902_v15  ;;  %v315_v47 = vmul.f32 %v314_v2, %v299_v63  ;;  %v324_v40 = vxor.u32 2147483648, %v307_v34 }
 0x13b   :  { %vm1641_vm11 = vcmp.lt.s32.totalorder %v1640_v51, 0  ;;  %v321_v35 = vxor.u32 2147483648, %v315_v47  ;;  %v325_v63 = vsel %vm323_vm0, %v324_v40, %v315_v47 }
 0x13c   :  { %v905_v23 = vsel %vm1641_vm11, 0, %v1640_v51 }
 0x13d   :  { %v906_v7 = vsub.s32 32, %v905_v23  ;;  %v907_v60 = vshll.u32 %v898_v6, %v905_v23  ;;  %v910_v58 = vsub.s32 4294967266, %v905_v23  ;;  %v322_v14 = vsel %vm320_vm15, %v307_v34, %v321_v35 }
 0x13e   :  { %v326_v23 = vsel %vm319_vm14, %v322_v14, %v325_v63 }
 0x13f   :  { %v908_v54 = vshrl.u32 %v890_v52, %v906_v7  ;;  %v911_v17 = vadd.s32 127, %v910_v58 }
 0x141   :  { %v909_v21 = vor.u32 %v908_v54, %v907_v60  ;;  %v912_v24 = vshll.u32 %v911_v17, 23  ;;  %v327_v60 = vsel %vm316_vm2, nan, %v326_v23 }
 0x143   :  { %v913_v12 = vor.u32 4788187, %v912_v24  ;;  %v916_v41 = vcvt.s32.f32 %v909_v21 }
 0x145   :  { %v914_v27 = vand.u32 2147483647, %v913_v12 }
 0x147   :  { %v917_v30 = vmul.f32 %v916_v41, %v914_v27 }
 0x149   :  { %v918_v18 = vxor.u32 2147483648, %v917_v30 }
 0x14b   :  { %v919_v39 = vsel %vm798_vm12, %v918_v18, %v917_v30 }
 0x14c   :  { %v922_v33 = vsel %vm2833_vm13, %v2583_v49, %v919_v39  ;;  %v1331_v49 = vpop.f32.mrf.mxu2 }
 0x14d   :  { %v924_v46 = vmul.f32 %v922_v33, %v922_v33 }
 0x14f   :  { %v925_v9 = vmul.f32 -0.001358992, %v924_v46  ;;  %v932_v53 = vmul.f32 -0.00019511016, %v924_v46 }
 0x151   :  { %v926_v62 = vadd.f32 0.041655596, %v925_v9  ;;  %v933_v36 = vadd.f32 0.008332121, %v932_v53 }
 0x153   :  { %v927_v61 = vmul.f32 %v926_v62, %v924_v46  ;;  %v934_v38 = vmul.f32 %v933_v36, %v924_v46 }
 0x155   :  { %v928_v6 = vadd.f32 -0.4999988, %v927_v61  ;;  %v935_v3 = vadd.f32 -0.16666654, %v934_v38 }
 0x157   :  { %v929_v13 = vmul.f32 %v928_v6, %v924_v46  ;;  %v936_v15 = vmul.f32 %v935_v3, %v924_v46 }
 0x159   :  { %v930_v56 = vadd.f32 1.0, %v929_v13  ;;  %v937_v51 = vadd.f32 1.0, %v936_v15 }
 0x15b   :  { %v938_v52 = vmul.f32 %v937_v51, %v922_v33  ;;  %v946_v10 = vxor.u32 2147483648, %v930_v56 }
 0x15d   :  { %v943_v0 = vxor.u32 2147483648, %v938_v52  ;;  %v947_v7 = vsel %vm945_vm1, %v946_v10, %v938_v52 }
 0x15f   :  { %v944_v58 = vsel %vm942_vm3, %v930_v56, %v943_v0  ;;  %v1339_v4 = vpop.f32.mrf.mxu2 }
 0x160   :  { %v948_v54 = vsel %vm941_vm6, %v944_v58, %v947_v7 }
 0x161   :  { %v949_v17 = vsel %vm939_vm5, nan, %v948_v54 }
 0x162   :  { %v1259_v42 = vadd.f32 %v949_v17, %v327_v60 }
 0x164   :  { %v1277_v11 = vsel %vm1272_vm4, %v1259_v42, 0  ;;  %vm1615_vm4 = vcmask 80896  }
 0x165   :  { %v1317_v21 = vand.u32 4294901760, %v1277_v11 }
 0x167   :  { %v1318_v24 = vsub.f32 %v1277_v11, %v1317_v21  ;;  %1403 = vmatmul.f32.gmra.mxu1 %v1317_v21 }
 0x169   :  { %v1319_v12 = vand.u32 4294901760, %v1318_v24  ;;  %1454 = vmatmul.f32.gmra.mxu2 %v1318_v24 }
 0x16b   :  { %v1320_v45 = vsub.f32 %v1318_v24, %v1319_v12  ;;  %1501 = vmatmul.f32.gmra.mxu3 %v1319_v12 }
 0x16d   :  { %v1321_v41 = vand.u32 4294901760, %v1320_v45 }
 0x16f   :  { %1322 = vmatmul.f32.gmra.mxu0 %v1321_v41  ;;  %1599 = vmatmul.f32.vlgmr.msrb.gmra.mxu1 %v2789_v19 }
 0x171   :  { %1459 = vmatmul.f32.gmra.mxu2 %v2274_v5  ;;  %v1408_v5 = vpop.f32.mrf.mxu3 }
 0x173   :  { %1507 = vmatmul.f32.gmra.mxu3 %v1327_v43 }
 0x177   :  { %1558 = vmatmul.f32.vlgmr.msrb.gmra.mxu0 %v2789_v19  ;;  %1603 = vmatmul.f32.gmra.mxu1 %v1317_v21 }
 0x179   :  { %1464 = vmatmul.f32.gmra.mxu2 %v2550_v37  ;;  %v1412_v19 = vpop.f32.mrf.mxu3  ;;  %v1671_v37 = vld [vmem:[%s2878_s2 + $0x40] ss:$0 sm:$0xff] }
 0x17a   :  { %v1332_v2 = vadd.f32 %v1671_v37, %v1331_v49  ;;  %v1340_v29 = vadd.f32 %v1671_v37, %v1339_v4 }
 0x17b   :  { %1513 = vmatmul.f32.gmra.mxu3 %v1335_v22 }
 0x17c   :  { %v1409_v16 = vadd.f32 %v1408_v5, %v1332_v2  ;;  %v1413_v40 = vadd.f32 %v1412_v19, %v1340_v29 }
 0x17f   :  { %1562 = vmatmul.f32.gmra.mxu0 %v1317_v21  ;;  %1607 = vmatmul.f32.gmra.mxu1 %v2270_v44 }
 0x187   :  { %1566 = vmatmul.f32.gmra.mxu0 %v2270_v44  ;;  %1611 = vmatmul.f32.gmra.mxu1 %v2545_v59 }
 0x18f   :  { %1570 = vmatmul.f32.gmra.mxu0 %v2545_v59 }
 0x199   :  { %v1400_v43 = vpop.f32.mrf.mxu1 }
 0x1a1   :  { %v1315_v8 = vpop.f32.mrf.mxu0  ;;  %v1450_v27 = vpop.f32.mrf.mxu2 }
 0x1a2   :  { %v1316_v22 = vadd.f32 %v1671_v37, %v1315_v8 }
 0x1a3   :  { %v1496_v30 = vpop.f32.mrf.mxu3 }
 0x1a4   :  { %v1401_v25 = vadd.f32 %v1400_v43, %v1316_v22 }
 0x1a6   :  { %v1451_v28 = vadd.f32 %v1450_v27, %v1401_v25 }
 0x1a8   :  { %v1497_v18 = vadd.f32 %v1496_v30, %v1451_v28 }
 0x1e4   :  { %v1404_v1 = vpop.f32.mrf.mxu1 }
 0x1ec   :  { %v1323_v44 = vpop.f32.mrf.mxu0  ;;  %v1600_v26 = vpop.f32.mrf.mxu1 }
 0x1ed   :  { %v1455_v31 = vpop.f32.mrf.mxu2  ;;  %v1324_v59 = vadd.f32 %v1671_v37, %v1323_v44 }
 0x1ee   :  { %v1502_v20 = vpop.f32.mrf.mxu3 }
 0x1ef   :  { %v1405_v39 = vadd.f32 %v1404_v1, %v1324_v59 }
 0x1f1   :  { %v1456_v32 = vadd.f32 %v1455_v31, %v1405_v39 }
 0x1f3   :  { %v1503_v53 = vadd.f32 %v1502_v20, %v1456_v32 }
 0x1f4   :  { %v1559_v48 = vpop.f32.mrf.mxu0  ;;  %v1604_v55 = vpop.f32.mrf.mxu1 }
 0x1f5   :  { %v1560_v33 = vadd.f32 %v1559_v48, %v1497_v18  ;;  %v1460_v9 = vpop.f32.mrf.mxu2 }
 0x1f6   :  { %v1508_v47 = vpop.f32.mrf.mxu3  ;;  %v1461_v36 = vadd.f32 %v1460_v9, %v1409_v16 }
 0x1f7   :  { %v1601_v46 = vadd.f32 %v1600_v26, %v1560_v33 }
 0x1f8   :  { %v1509_v61 = vadd.f32 %v1508_v47, %v1461_v36 }
 0x1f9   :  { %1616 = vst.msk [vmem:[%s2881_s3] sm:$0xff] %vm1615_vm4, %v1601_v46 }
 0x1fc   :  { %v1563_v34 = vpop.f32.mrf.mxu0  ;;  %v1608_v38 = vpop.f32.mrf.mxu1 }
 0x1fd   :  { %v1564_v62 = vadd.f32 %v1563_v34, %v1503_v53  ;;  %v1465_v35 = vpop.f32.mrf.mxu2 }
 0x1fe   :  { %v1466_v57 = vadd.f32 %v1465_v35, %v1413_v40  ;;  %v1514_v13 = vpop.f32.mrf.mxu3 }
 0x1ff   :  { %v1605_v50 = vadd.f32 %v1604_v55, %v1564_v62 }
 0x200   :  { %v1515_v14 = vadd.f32 %v1514_v13, %v1466_v57 }
 0x201   :  { %1617 = vst.msk [vmem:[%s2881_s3 + $0x8] sm:$0xff] %vm1615_vm4, %v1605_v50 }
 0x204   :  { %v1567_v6 = vpop.f32.mrf.mxu0  ;;  %v1612_v56 = vpop.f32.mrf.mxu1 }
 0x205   :  { %v1568_v3 = vadd.f32 %v1567_v6, %v1509_v61 }
 0x207   :  { %v1609_v15 = vadd.f32 %v1608_v38, %v1568_v3 }
 0x209   :  { %1618 = vst.msk [vmem:[%s2881_s3 + $0x10] sm:$0xff] %vm1615_vm4, %v1609_v15 }
 0x20c   :  { %v1571_v63 = vpop.f32.mrf.mxu0 }
 0x20d   :  { %v1572_v51 = vadd.f32 %v1571_v63, %v1515_v14 }
 0x20f   :  { %v1613_v52 = vadd.f32 %v1612_v56, %v1572_v51 }
 0x211   :  { %1619 = vst.msk [vmem:[%s2881_s3 + $0x18] sm:$0xff] %vm1615_vm4, %v1613_v52 }

</bundles_post_ra>
